<compile_context>
chip_gen: v7x
topology: tpu7x:2x2x1
jax: 0.10.0
libtpu: 0.0.40
codegen_flags: <defaults>
</compile_context>

<pallas_src>
import functools

import jax
import jax.numpy as jnp
from jax.experimental import pallas as pl
from jax.experimental.pallas import tpu as pltpu


def _round_up(x, m):
    return ((x + m - 1) // m) * m


def _tensorcores_per_chip():
    """Best-effort: 2 TensorCores on megacore-style chips (v4/v5p/v7x), else 1."""
    try:
        kind = jax.devices()[0].device_kind.lower()
    except Exception:
        return 1
    if any(tag in kind for tag in ("v7", "7x", "v5p", "v4")):
        return 2
    return 1


def _mlp_kernel(n_layers, x_ref, *refs):
    """refs = (w0, b0, w1, b1, ..., w_{L-1}, b_{L-1}, out).

    Weights arrive in bf16 (hidden dims zero-padded to 128); biases in f32 as
    (1, d_out). Activations stay f32 (v5e has no bf16 VPU/EUP); operands are
    cast to bf16 only at the MXU dot, which accumulates in f32.
    """
    o_ref = refs[-1]
    h = x_ref[...].astype(jnp.float32)
    for i in range(n_layers):
        w = refs[2 * i][...]                 # bf16 (d_in_p, d_out_p)
        b = refs[2 * i + 1][...]             # f32  (1, d_out_p) -> broadcasts
        h = jnp.dot(h.astype(jnp.bfloat16), w,
                    preferred_element_type=jnp.float32) + b
        if i < n_layers - 1:
            # Dropout (eval mode) is identity; activation is ReLU on the VPU.
            # TODO(synk): training-mode dropout (pltpu.prng_seed +
            # pltpu.prng_random_bits mask) not implemented.
            h = jnp.maximum(h, 0.0)
    o_ref[...] = h.astype(o_ref.dtype)


def prepare_params(weights, biases):
    """One-time parameter preprocessing (hoisted out of the per-call path).

    * Hidden widths are zero-padded up to a multiple of 128 -> lane-dense
      intermediate activations and full-K MXU passes (padding with exact
      zeros does not change the result).
    * Weights are cast to bf16 (MXU-native on v5e/v6e/v7x).
    * Biases become f32 (1, d) row tiles.
    The first layer's input dim and the last layer's output dim stay unpadded
    (they match x and the logits respectively).
    """
    n = len(weights)
    pw, pb = [], []
    for i, (w, b) in enumerate(zip(weights, biases)):
        d_in, d_out = w.shape
        d_in_p = _round_up(d_in, 128) if i > 0 else d_in
        d_out_p = _round_up(d_out, 128) if i < n - 1 else d_out
        w_p = jnp.zeros((d_in_p, d_out_p), jnp.bfloat16)
        w_p = w_p.at[:d_in, :d_out].set(w.astype(jnp.bfloat16))
        b_p = jnp.zeros((1, d_out_p), jnp.float32)
        b_p = b_p.at[:, :d_out].set(b.astype(jnp.float32).reshape(1, -1))
        pw.append(w_p)
        pb.append(b_p)
    return pw, pb


# Cap rows per tile so double-buffered input/output blocks + the f32
# (tile_m, 128) intermediates stay far below v7x's 64 MiB VMEM as well as
# v5e/v6e's 128 MiB. Re-derive from the VMEM budget if the MLP grows.
_MAX_TILE_M = 2048


def ner_module_forward(x, weights, biases, *, num_row_splits=None):
    """x: (..., in_dim). weights/biases must come from prepare_params()."""
    n_layers = len(weights)
    in_dim = x.shape[-1]
    out_dim = weights[-1].shape[1]

    lead_shape = x.shape[:-1]
    x2d = x.reshape(-1, in_dim)
    N = x2d.shape[0]

    # --- Row tiling: one tile per TensorCore, no wasted padded rows. ---
    if num_row_splits is None:
        num_row_splits = _tensorcores_per_chip()
    tile_m = min(_round_up(pl.cdiv(N, num_row_splits), 8), _MAX_TILE_M)
    n_pad = _round_up(N, tile_m)
    x_p = x2d if n_pad == N else jnp.pad(x2d, ((0, n_pad - N), (0, 0)))

    grid = (n_pad // tile_m,)

    in_specs = [pl.BlockSpec((tile_m, in_dim), lambda i: (i, 0))]
    param_args = []
    for w, b in zip(weights, biases):
        # Grid-invariant whole-weight / bias blocks (<100 KiB total here).
        # TODO(synk): single-buffer (pl.Buffered(1)) or hold resident via
        # memory_space=pl.ANY + one-time DMA if the MLP scales up (v7x has
        # only 64 MiB VMEM).
        in_specs.append(pl.BlockSpec(w.shape, lambda i: (0, 0)))
        in_specs.append(pl.BlockSpec(b.shape, lambda i: (0, 0)))
        param_args.extend([w, b])

    # Output kept at its true width: a (tile_m, out_dim) block of the
    # contiguous (n_pad, out_dim) array is one contiguous HBM burst per tile,
    # avoiding 16x write amplification from padding out_dim=8 to 128 lanes.
    out_spec = pl.BlockSpec((tile_m, out_dim), lambda i: (i, 0))

    # Advisory cost estimate so XLA schedules around the custom call sensibly.
    flops = 2 * n_pad * sum(w.shape[0] * w.shape[1] for w in weights)
    bytes_accessed = (
        x_p.size * x_p.dtype.itemsize
        + sum(w.size * w.dtype.itemsize for w in weights)
        + sum(b.size * b.dtype.itemsize for b in biases)
        + n_pad * out_dim * x.dtype.itemsize
    )
    cost = pl.CostEstimate(flops=int(flops), transcendentals=0,
                           bytes_accessed=int(bytes_accessed))

    out_full = pl.pallas_call(
        functools.partial(_mlp_kernel, n_layers),
        out_shape=jax.ShapeDtypeStruct((n_pad, out_dim), x.dtype),
        grid_spec=pltpu.PrefetchScalarGridSpec(
            num_scalar_prefetch=0,
            grid=grid,
            in_specs=in_specs,
            out_specs=out_spec,
        ),
        compiler_params=pltpu.CompilerParams(
            dimension_semantics=("parallel",),
        ),
        cost_estimate=cost,
    )(x_p, *param_args)

    out = out_full if n_pad == N else out_full[:N]
    return out.reshape(*lead_shape, out_dim)


def init_params(key, n_layers, in_dim, out_dim):
    """Init mimicking torch.nn.Linear (uniform +-1/sqrt(fan_in)); weights
    already transposed to (in, out)."""
    dims = [(in_dim, in_dim)] * (n_layers - 1) + [(in_dim, out_dim)]
    weights, biases = [], []
    for (d_in, d_out) in dims:
        key, kw, kb = jax.random.split(key, 3)
        bound = 1.0 / jnp.sqrt(jnp.float32(d_in))
        w = jax.random.uniform(kw, (d_in, d_out), jnp.float32, -bound, bound)
        b = jax.random.uniform(kb, (d_out,), jnp.float32, -bound, bound)
        weights.append(w)
        biases.append(b)
    return weights, biases


def reference_forward(x, weights, biases):
    """Pure-JAX reference with the same numerics (bf16 dot operands, f32 acc)."""
    h = x.reshape(-1, x.shape[-1]).astype(jnp.float32)
    n = len(weights)
    for i, (w, b) in enumerate(zip(weights, biases)):
        h = jnp.dot(h.astype(jnp.bfloat16), w.astype(jnp.bfloat16),
                    preferred_element_type=jnp.float32) + b
        if i < n - 1:
            h = jnp.maximum(h, 0.0)
    return h.reshape(*x.shape[:-1], -1)


if __name__ == "__main__":
    key = jax.random.PRNGKey(0)

    n_layers = 3          # 2x (Linear(in,in) -> Dropout -> ReLU) + Linear(in,out)
    in_dim = 32
    out_dim = 8
    batch, seq = 4, 200   # N = 800 tokens -> 1 tile (or 2 on megacore chips)

    key, kx = jax.random.split(key)
    x = jax.random.normal(kx, (batch, seq, in_dim), jnp.float32)

    weights, biases = init_params(key, n_layers, in_dim, out_dim)
    # One-time parameter prep (bf16 cast, hidden padding, bias reshape) —
    # hoisted out of the per-call path per the perf review.
    p_weights, p_biases = prepare_params(weights, biases)

    forward = jax.jit(ner_module_forward)
    out = forward(x, p_weights, p_biases)
    out = jax.block_until_ready(out)

    ref = reference_forward(x, weights, biases)
    assert out.shape == (batch, seq, out_dim)
    assert jnp.allclose(out, ref, atol=2e-3, rtol=2e-3), "mismatch vs JAX reference"

    print("KERNEL_OK")
</pallas_src>

<mosaic_0001>
module attributes {stable_mosaic.version = 11 : i64} {
  func.func @_mlp_kernel(%arg0: i32, %arg1: memref<800x32xf32, #tpu.memory_space<vmem>>, %arg2: memref<32x128xbf16, #tpu.memory_space<vmem>>, %arg3: memref<1x128xf32, #tpu.memory_space<vmem>>, %arg4: memref<128x128xbf16, #tpu.memory_space<vmem>>, %arg5: memref<1x128xf32, #tpu.memory_space<vmem>>, %arg6: memref<128x8xbf16, #tpu.memory_space<vmem>>, %arg7: memref<1x8xf32, #tpu.memory_space<vmem>>, %arg8: memref<800x8xf32, #tpu.memory_space<vmem>>) attributes {dimension_semantics = [#tpu.dimension_semantics<parallel>], iteration_bounds = array<i64: 1>, scalar_prefetch = 0 : i64, scratch_operands = 0 : i64, tpu.core_type = #tpu.core_type<tc>, window_params = [{transform_indices = @transform_0, window_bounds = array<i64: 800, 32>}, {pipeline_mode = #tpu.pipeline_mode<synchronous>, transform_indices = @transform_1, window_bounds = array<i64: 32, 128>}, {pipeline_mode = #tpu.pipeline_mode<synchronous>, transform_indices = @transform_2, window_bounds = array<i64: 1, 128>}, {pipeline_mode = #tpu.pipeline_mode<synchronous>, transform_indices = @transform_3, window_bounds = array<i64: 128, 128>}, {pipeline_mode = #tpu.pipeline_mode<synchronous>, transform_indices = @transform_4, window_bounds = array<i64: 1, 128>}, {pipeline_mode = #tpu.pipeline_mode<synchronous>, transform_indices = @transform_5, window_bounds = array<i64: 128, 8>}, {pipeline_mode = #tpu.pipeline_mode<synchronous>, transform_indices = @transform_6, window_bounds = array<i64: 1, 8>}, {transform_indices = @transform_7, window_bounds = array<i64: 800, 8>}]} {
    %c0 = arith.constant 0 : index
    %c0_0 = arith.constant 0 : index
    %0 = vector.load %arg1[%c0, %c0_0] : memref<800x32xf32, #tpu.memory_space<vmem>>, vector<800x32xf32>
    %c0_1 = arith.constant 0 : index
    %c0_2 = arith.constant 0 : index
    %1 = vector.load %arg2[%c0_1, %c0_2] : memref<32x128xbf16, #tpu.memory_space<vmem>>, vector<32x128xbf16>
    %c0_3 = arith.constant 0 : index
    %c0_4 = arith.constant 0 : index
    %2 = vector.load %arg3[%c0_3, %c0_4] : memref<1x128xf32, #tpu.memory_space<vmem>>, vector<1x128xf32>
    %3 = arith.truncf %0 : vector<800x32xf32> to vector<800x32xbf16>
    %cst = arith.constant dense<0.000000e+00> : vector<800x128xf32>
    %4 = tpu.matmul %3, %1, %cst {dimension_numbers = #tpu.dot_dimension_numbers<[1], [0], [0], [1], [0, 0, 1, 1], [], []>} : vector<800x32xbf16>, vector<32x128xbf16>, vector<800x128xf32> -> vector<800x128xf32>
    %5 = vector.broadcast %2 : vector<1x128xf32> to vector<800x128xf32>
    %6 = arith.addf %4, %5 : vector<800x128xf32>
    %cst_5 = arith.constant 0.000000e+00 : f32
    %7 = vector.broadcast %cst_5 : f32 to vector<800x128xf32>
    %8 = arith.maximumf %6, %7 : vector<800x128xf32>
    %c0_6 = arith.constant 0 : index
    %c0_7 = arith.constant 0 : index
    %9 = vector.load %arg4[%c0_6, %c0_7] : memref<128x128xbf16, #tpu.memory_space<vmem>>, vector<128x128xbf16>
    %c0_8 = arith.constant 0 : index
    %c0_9 = arith.constant 0 : index
    %10 = vector.load %arg5[%c0_8, %c0_9] : memref<1x128xf32, #tpu.memory_space<vmem>>, vector<1x128xf32>
    %11 = arith.truncf %8 : vector<800x128xf32> to vector<800x128xbf16>
    %cst_10 = arith.constant dense<0.000000e+00> : vector<800x128xf32>
    %12 = tpu.matmul %11, %9, %cst_10 {dimension_numbers = #tpu.dot_dimension_numbers<[1], [0], [0], [1], [0, 0, 1, 1], [], []>} : vector<800x128xbf16>, vector<128x128xbf16>, vector<800x128xf32> -> vector<800x128xf32>
    %13 = vector.broadcast %10 : vector<1x128xf32> to vector<800x128xf32>
    %14 = arith.addf %12, %13 : vector<800x128xf32>
    %cst_11 = arith.constant 0.000000e+00 : f32
    %15 = vector.broadcast %cst_11 : f32 to vector<800x128xf32>
    %16 = arith.maximumf %14, %15 : vector<800x128xf32>
    %c0_12 = arith.constant 0 : index
    %c0_13 = arith.constant 0 : index
    %17 = vector.load %arg6[%c0_12, %c0_13] : memref<128x8xbf16, #tpu.memory_space<vmem>>, vector<128x8xbf16>
    %c0_14 = arith.constant 0 : index
    %c0_15 = arith.constant 0 : index
    %18 = vector.load %arg7[%c0_14, %c0_15] : memref<1x8xf32, #tpu.memory_space<vmem>>, vector<1x8xf32>
    %19 = arith.truncf %16 : vector<800x128xf32> to vector<800x128xbf16>
    %cst_16 = arith.constant dense<0.000000e+00> : vector<800x8xf32>
    %20 = tpu.matmul %19, %17, %cst_16 {dimension_numbers = #tpu.dot_dimension_numbers<[1], [0], [0], [1], [0, 0, 1, 1], [], []>} : vector<800x128xbf16>, vector<128x8xbf16>, vector<800x8xf32> -> vector<800x8xf32>
    %21 = vector.broadcast %18 : vector<1x8xf32> to vector<800x8xf32>
    %22 = arith.addf %20, %21 : vector<800x8xf32>
    %c0_17 = arith.constant 0 : index
    %c0_18 = arith.constant 0 : index
    %23 = vector.load %arg8[%c0_17, %c0_18] : memref<800x8xf32, #tpu.memory_space<vmem>>, vector<800x8xf32>
    tpu.vector_store %arg8[%c0_17, %c0_18], %22 {strides = array<i32>} : memref<800x8xf32, #tpu.memory_space<vmem>>, vector<800x8xf32>,
    return
  }
  func.func @transform_0(%arg0: i32) -> (i32, i32) {
    %c0_i32 = arith.constant 0 : i32
    %c0_i32_0 = arith.constant 0 : i32
    return %arg0, %c0_i32 : i32, i32
  }
  func.func @transform_1(%arg0: i32) -> (i32, i32) {
    %c0_i32 = arith.constant 0 : i32
    %c0_i32_0 = arith.constant 0 : i32
    %c0_i32_1 = arith.constant 0 : i32
    return %c0_i32, %c0_i32_0 : i32, i32
  }
  func.func @transform_2(%arg0: i32) -> (i32, i32) {
    %c0_i32 = arith.constant 0 : i32
    %c0_i32_0 = arith.constant 0 : i32
    %c0_i32_1 = arith.constant 0 : i32
    return %c0_i32, %c0_i32_0 : i32, i32
  }
  func.func @transform_3(%arg0: i32) -> (i32, i32) {
    %c0_i32 = arith.constant 0 : i32
    %c0_i32_0 = arith.constant 0 : i32
    %c0_i32_1 = arith.constant 0 : i32
    return %c0_i32, %c0_i32_0 : i32, i32
  }
  func.func @transform_4(%arg0: i32) -> (i32, i32) {
    %c0_i32 = arith.constant 0 : i32
    %c0_i32_0 = arith.constant 0 : i32
    %c0_i32_1 = arith.constant 0 : i32
    return %c0_i32, %c0_i32_0 : i32, i32
  }
  func.func @transform_5(%arg0: i32) -> (i32, i32) {
    %c0_i32 = arith.constant 0 : i32
    %c0_i32_0 = arith.constant 0 : i32
    %c0_i32_1 = arith.constant 0 : i32
    return %c0_i32, %c0_i32_0 : i32, i32
  }
  func.func @transform_6(%arg0: i32) -> (i32, i32) {
    %c0_i32 = arith.constant 0 : i32
    %c0_i32_0 = arith.constant 0 : i32
    %c0_i32_1 = arith.constant 0 : i32
    return %c0_i32, %c0_i32_0 : i32, i32
  }
  func.func @transform_7(%arg0: i32) -> (i32, i32) {
    %c0_i32 = arith.constant 0 : i32
    %c0_i32_0 = arith.constant 0 : i32
    return %arg0, %c0_i32 : i32, i32
  }
}

</mosaic_0001>

<bundles_post_ra>
// kernel: ner_module_forward.1
= control target key start
LH: loop header
LB: loop body
LE: loop exit
PB: predicated region body
PF: predicated region fallthrough
CT: control target
= control target key end

     0   :  { %vm200_vm0 = vcmask 261120   ;;  %vm2092_vm1 = vcmask 64512   ;;  %s4013_s1 = inlined_call_operand.vmem [shape: bf16[32,128], index: 1, kind: input, shape index: {}]   ;;  %s4014_s0 = inlined_call_operand.vmem [shape: f32[800,32], index: 0, kind: input, shape index: {}]   ;;  %s4015_s3 = inlined_call_operand.vmem [shape: bf16[128,128], index: 3, kind: input, shape index: {}]   ;;  %s4016_s2 = inlined_call_operand.vmem [shape: f32[1,128], index: 2, kind: input, shape index: {}]   ;;  %s4017_s5 = inlined_call_operand.vmem [shape: bf16[128,8], index: 5, kind: input, shape index: {}]   ;;  %s4018_s4 = inlined_call_operand.vmem [shape: f32[1,128], index: 4, kind: input, shape index: {}]   ;;  %s4019_s6 = inlined_call_operand.vmem [shape: f32[1,8], index: 6, kind: input, shape index: {}]   ;;  %s4020_s7 = inlined_call_operand.vmem [shape: f32[800,8], index: 7, kind: output, shape index: {}]  }
   0x1   :  { %v2776_v0 = vld [vmem:[%s4013_s1] sm:$0xff]   ;;  %v2777_v1 = vld [vmem:[%s4013_s1 + $0x8] sm:$0xff]   ;;  %v29_v5 = vld [vmem:[%s4014_s0 + $0x10] sm:$0xff] }
   0x2   :  { %2436 = vmatprep.subr.bf16.mxu0 %v2776_v0  ;;  %v27_v2 = vld [vmem:[%s4014_s0] sm:$0xff]  ;;  %v28_v3 = vld [vmem:[%s4014_s0 + $0x8] sm:$0xff]  ;;  %2772 = vmatprep.subr.bf16.mxu1 %v2776_v0  ;;  %v30_v6 = vld [vmem:[%s4014_s0 + $0x18] sm:$0xff] }
   0x3   :  { %2437 = vmatpush3.bf16.msra.mxu0 %v2776_v0  ;;  %v132_v4 = vpack.c.bf16 %v28_v3, %v27_v2  ;;  %2774 = vmatpush3.bf16.msra.mxu1 %v2776_v0  ;;  %v31_v7 = vld [vmem:[%s4014_s0 + $0x20] sm:$0xff]  ;;  %v32_v8 = vld [vmem:[%s4014_s0 + $0x28] sm:$0xff]  ;;  %v133_v9 = vpack.c.bf16 %v30_v6, %v29_v5  ;;  %v33_v11 = vld [vmem:[%s4014_s0 + $0x30] sm:$0xff] }
   0x4   :  { %2438 = vmatprep.subr.bf16.mxu0 %v2777_v1  ;;  %2773 = vmatprep.subr.bf16.mxu1 %v2777_v1  ;;  %v134_v10 = vpack.c.bf16 %v32_v8, %v31_v7  ;;  %v34_v12 = vld [vmem:[%s4014_s0 + $0x38] sm:$0xff]  ;;  %v35_v13 = vld [vmem:[%s4014_s0 + $0x40] sm:$0xff]  ;;  %v36_v14 = vld [vmem:[%s4014_s0 + $0x48] sm:$0xff] }
   0x5   :  { %2440 = vmatprep.mubr.msk.bf16.mxu0 %vm200_vm0, %v132_v4  ;;  %v135_v15 = vpack.c.bf16 %v34_v12, %v33_v11  ;;  %v136_v16 = vpack.c.bf16 %v36_v14, %v35_v13  ;;  %v37_v17 = vld [vmem:[%s4014_s0 + $0x50] sm:$0xff]  ;;  %v38_v18 = vld [vmem:[%s4014_s0 + $0x58] sm:$0xff]  ;;  %v39_v19 = vld [vmem:[%s4014_s0 + $0x60] sm:$0xff] }
   0x6   :  { %v40_v20 = vld [vmem:[%s4014_s0 + $0x68] sm:$0xff]  ;;  %v79_v21 = vld [vmem:[%s4014_s0 + $0x1a0] sm:$0xff]  ;;  %v81_v24 = vld [vmem:[%s4014_s0 + $0x1b0] sm:$0xff]  ;;  %v137_v29 = vpack.c.bf16 %v38_v18, %v37_v17 }
   0x7   :  { %2439 = vmatpush3.bf16.msra.mxu0 %v2777_v1  ;;  %2775 = vmatpush3.bf16.msra.mxu1 %v2777_v1  ;;  %v80_v22 = vld [vmem:[%s4014_s0 + $0x1a8] sm:$0xff]  ;;  %v82_v25 = vld [vmem:[%s4014_s0 + $0x1b8] sm:$0xff]  ;;  %v83_v26 = vld [vmem:[%s4014_s0 + $0x1c0] sm:$0xff]  ;;  %v138_v31 = vpack.c.bf16 %v40_v20, %v39_v19 }
   0x8   :  { %v158_v23 = vpack.c.bf16 %v80_v22, %v79_v21  ;;  %v159_v27 = vpack.c.bf16 %v82_v25, %v81_v24  ;;  %v84_v28 = vld [vmem:[%s4014_s0 + $0x1c8] sm:$0xff]  ;;  %v85_v32 = vld [vmem:[%s4014_s0 + $0x1d0] sm:$0xff]  ;;  %v86_v33 = vld [vmem:[%s4014_s0 + $0x1d8] sm:$0xff] }
   0x9   :  { %v160_v30 = vpack.c.bf16 %v84_v28, %v83_v26  ;;  %v87_v34 = vld [vmem:[%s4014_s0 + $0x1e0] sm:$0xff]  ;;  %v88_v35 = vld [vmem:[%s4014_s0 + $0x1e8] sm:$0xff]  ;;  %v41_v37 = vld [vmem:[%s4014_s0 + $0x70] sm:$0xff]  ;;  %v161_v39 = vpack.c.bf16 %v86_v33, %v85_v32 }
   0xa   :  { %2441 = vmatmul.mubr.msk.bf16.vlgmr.msra.gmra.mrb[0].mxu0 %vm200_vm0, %v133_v9  ;;  %2492 = vmatprep.mubr.msk.bf16.mxu1 %vm200_vm0, %v158_v23  ;;  %v2778_v36 = vld [vmem:[%s4015_s3] sm:$0xff]   ;;  %v42_v38 = vld [vmem:[%s4014_s0 + $0x78] sm:$0xff]  ;;  %v2779_v40 = vld [vmem:[%s4015_s3 + $0x8] sm:$0xff]   ;;  %v162_v43 = vpack.c.bf16 %v88_v35, %v87_v34 }
   0xb   :  { %2444 = vmatprep.mubr.msk.bf16.mxu0 %vm200_vm0, %v134_v10  ;;  %2493 = vmatmul.mubr.msk.bf16.vlgmr.msra.gmra.mrb[0].mxu1 %vm200_vm0, %v159_v27  ;;  %v43_v41 = vld [vmem:[%s4014_s0 + $0x80] sm:$0xff]  ;;  %v44_v42 = vld [vmem:[%s4014_s0 + $0x88] sm:$0xff]  ;;  %v139_v44 = vpack.c.bf16 %v42_v38, %v41_v37  ;;  %v89_v46 = vld [vmem:[%s4014_s0 + $0x1f0] sm:$0xff] }
   0xc   :  { %2496 = vmatprep.mubr.msk.bf16.mxu1 %vm200_vm0, %v160_v30  ;;  %2540 = vmatprep.subr.bf16.mxu1 %v2778_v36  ;;  %v140_v45 = vpack.c.bf16 %v44_v42, %v43_v41  ;;  %v2780_v47 = vld [vmem:[%s4015_s3 + $0x10] sm:$0xff]   ;;  %v90_v48 = vld [vmem:[%s4014_s0 + $0x1f8] sm:$0xff]  ;;  %v91_v49 = vld [vmem:[%s4014_s0 + $0x200] sm:$0xff] }
   0xd   :  { %2541 = vmatpush3.bf16.msra.mxu1 %v2778_v36  ;;  %v92_v50 = vld [vmem:[%s4014_s0 + $0x208] sm:$0xff]  ;;  %v2781_v51 = vld [vmem:[%s4015_s3 + $0x18] sm:$0xff]   ;;  %v45_v52 = vld [vmem:[%s4014_s0 + $0x90] sm:$0xff]  ;;  %v163_v54 = vpack.c.bf16 %v90_v48, %v89_v46 }
   0xe   :  { %2542 = vmatprep.subr.bf16.mxu1 %v2779_v40  ;;  %v46_v53 = vld [vmem:[%s4014_s0 + $0x98] sm:$0xff]  ;;  %v47_v55 = vld [vmem:[%s4014_s0 + $0xa0] sm:$0xff]  ;;  %v48_v56 = vld [vmem:[%s4014_s0 + $0xa8] sm:$0xff]  ;;  %v164_v57 = vpack.c.bf16 %v92_v50, %v91_v49 }
   0xf   :  { %v2782_v58 = vld [vmem:[%s4015_s3 + $0x20] sm:$0xff]   ;;  %v141_v59 = vpack.c.bf16 %v46_v53, %v45_v52  ;;  %v142_v60 = vpack.c.bf16 %v48_v56, %v47_v55  ;;  %v93_v61 = vld [vmem:[%s4014_s0 + $0x210] sm:$0xff]  ;;  %v94_v62 = vld [vmem:[%s4014_s0 + $0x218] sm:$0xff] }
  0x10   :  { %v95_v63 = vld [vmem:[%s4014_s0 + $0x220] sm:$0xff]  ;;  %v96_v0 = vld [vmem:[%s4014_s0 + $0x228] sm:$0xff]  ;;  %v49_v2 = vld [vmem:[%s4014_s0 + $0xb0] sm:$0xff]  ;;  %v165_v4 = vpack.c.bf16 %v94_v62, %v93_v61 }
  0x11   :  { %2543 = vmatpush3.bf16.msra.mxu1 %v2779_v40  ;;  %v2783_v1 = vld [vmem:[%s4015_s3 + $0x28] sm:$0xff]   ;;  %v50_v3 = vld [vmem:[%s4014_s0 + $0xb8] sm:$0xff]  ;;  %v51_v5 = vld [vmem:[%s4014_s0 + $0xc0] sm:$0xff]  ;;  %v166_v7 = vpack.c.bf16 %v96_v0, %v95_v63 }
  0x12   :  { %2445 = vmatmul.mubr.msk.bf16.gmra.mrb[4].mxu0 %vm200_vm0, %v135_v15  ;;  %2544 = vmatprep.subr.bf16.mxu1 %v2780_v47  ;;  %v52_v6 = vld [vmem:[%s4014_s0 + $0xc8] sm:$0xff]  ;;  %v2784_v8 = vld [vmem:[%s4015_s3 + $0x30] sm:$0xff]   ;;  %v143_v9 = vpack.c.bf16 %v50_v3, %v49_v2  ;;  %v98_v12 = vld [vmem:[%s4014_s0 + $0x238] sm:$0xff] }
  0x13   :  { %2448 = vmatprep.mubr.msk.bf16.mxu0 %vm200_vm0, %v136_v16  ;;  %2497 = vmatmul.mubr.msk.bf16.gmra.mrb[4].mxu1 %vm200_vm0, %v161_v39  ;;  %v144_v10 = vpack.c.bf16 %v52_v6, %v51_v5  ;;  %v97_v11 = vld [vmem:[%s4014_s0 + $0x230] sm:$0xff]  ;;  %v99_v13 = vld [vmem:[%s4014_s0 + $0x240] sm:$0xff]  ;;  %v100_v14 = vld [vmem:[%s4014_s0 + $0x248] sm:$0xff] }
  0x14   :  { %2500 = vmatprep.mubr.msk.bf16.mxu1 %vm200_vm0, %v162_v43  ;;  %v2785_v15 = vld [vmem:[%s4015_s3 + $0x38] sm:$0xff]   ;;  %v53_v16 = vld [vmem:[%s4014_s0 + $0xd0] sm:$0xff]  ;;  %v167_v18 = vpack.c.bf16 %v98_v12, %v97_v11  ;;  %v55_v19 = vld [vmem:[%s4014_s0 + $0xe0] sm:$0xff]  ;;  %v168_v21 = vpack.c.bf16 %v100_v14, %v99_v13 }
  0x15   :  { %2545 = vmatpush3.bf16.msra.mxu1 %v2780_v47  ;;  %v54_v17 = vld [vmem:[%s4014_s0 + $0xd8] sm:$0xff]  ;;  %v56_v20 = vld [vmem:[%s4014_s0 + $0xe8] sm:$0xff]  ;;  %v101_v24 = vld [vmem:[%s4014_s0 + $0x250] sm:$0xff] }
  0x16   :  { %2546 = vmatprep.subr.bf16.mxu1 %v2781_v51  ;;  %v145_v22 = vpack.c.bf16 %v54_v17, %v53_v16  ;;  %v146_v23 = vpack.c.bf16 %v56_v20, %v55_v19  ;;  %v102_v25 = vld [vmem:[%s4014_s0 + $0x258] sm:$0xff]  ;;  %v103_v26 = vld [vmem:[%s4014_s0 + $0x260] sm:$0xff]  ;;  %v104_v27 = vld [vmem:[%s4014_s0 + $0x268] sm:$0xff] }
  0x17   :  { %v57_v28 = vld [vmem:[%s4014_s0 + $0xf0] sm:$0xff]  ;;  %v169_v30 = vpack.c.bf16 %v102_v25, %v101_v24  ;;  %v60_v32 = vld [vmem:[%s4014_s0 + $0x108] sm:$0xff]  ;;  %v170_v33 = vpack.c.bf16 %v104_v27, %v103_v26  ;;  %v106_v37 = vld [vmem:[%s4014_s0 + $0x278] sm:$0xff] }
  0x18   :  { %v105_v36 = vld [vmem:[%s4014_s0 + $0x270] sm:$0xff]  ;;  %v107_v38 = vld [vmem:[%s4014_s0 + $0x280] sm:$0xff]  ;;  %v108_v39 = vld [vmem:[%s4014_s0 + $0x288] sm:$0xff] }
  0x19   :  { %2547 = vmatpush3.bf16.msra.mxu1 %v2781_v51  ;;  %v61_v40 = vld [vmem:[%s4014_s0 + $0x110] sm:$0xff]  ;;  %v62_v41 = vld [vmem:[%s4014_s0 + $0x118] sm:$0xff]  ;;  %v171_v42 = vpack.c.bf16 %v106_v37, %v105_v36  ;;  %v63_v43 = vld [vmem:[%s4014_s0 + $0x120] sm:$0xff] }
  0x1a   :  { %2449 = vmatmul.mubr.msk.bf16.gmra.mrb[8].mxu0 %vm200_vm0, %v137_v29  ;;  %2548 = vmatprep.subr.bf16.mxu1 %v2782_v58  ;;  %v58_v29 = vld [vmem:[%s4014_s0 + $0xf8] sm:$0xff]  ;;  %v149_v46 = vpack.c.bf16 %v62_v41, %v61_v40  ;;  %v109_v48 = vld [vmem:[%s4014_s0 + $0x290] sm:$0xff]  ;;  %v111_v50 = vld [vmem:[%s4014_s0 + $0x2a0] sm:$0xff] }
  0x1b   :  { %2452 = vmatprep.mubr.msk.bf16.mxu0 %vm200_vm0, %v138_v31  ;;  %2501 = vmatmul.mubr.msk.bf16.gmra.mrb[8].mxu1 %vm200_vm0, %v163_v54  ;;  %v59_v31 = vld [vmem:[%s4014_s0 + $0x100] sm:$0xff]  ;;  %v147_v34 = vpack.c.bf16 %v58_v29, %v57_v28  ;;  %v110_v49 = vld [vmem:[%s4014_s0 + $0x298] sm:$0xff]  ;;  %v112_v51 = vld [vmem:[%s4014_s0 + $0x2a8] sm:$0xff] }
  0x1c   :  { %2504 = vmatprep.mubr.msk.bf16.mxu1 %vm200_vm0, %v164_v57  ;;  %v148_v35 = vpack.c.bf16 %v60_v32, %v59_v31  ;;  %v65_v52 = vld [vmem:[%s4014_s0 + $0x130] sm:$0xff]  ;;  %v66_v53 = vld [vmem:[%s4014_s0 + $0x138] sm:$0xff]  ;;  %v173_v54 = vpack.c.bf16 %v110_v49, %v109_v48  ;;  %v67_v55 = vld [vmem:[%s4014_s0 + $0x140] sm:$0xff]  ;;  %v174_v57 = vpack.c.bf16 %v112_v51, %v111_v50 }
  0x1d   :  { %2549 = vmatpush3.bf16.msra.mxu1 %v2782_v58  ;;  %v68_v56 = vld [vmem:[%s4014_s0 + $0x148] sm:$0xff]  ;;  %v151_v58 = vpack.c.bf16 %v66_v53, %v65_v52  ;;  %v114_v61 = vld [vmem:[%s4014_s0 + $0x2b8] sm:$0xff]  ;;  %v115_v62 = vld [vmem:[%s4014_s0 + $0x2c0] sm:$0xff] }
  0x1e   :  { %2550 = vmatprep.subr.bf16.mxu1 %v2783_v1  ;;  %v116_v63 = vld [vmem:[%s4014_s0 + $0x2c8] sm:$0xff]  ;;  %v69_v0 = vld [vmem:[%s4014_s0 + $0x150] sm:$0xff]  ;;  %v71_v3 = vld [vmem:[%s4014_s0 + $0x160] sm:$0xff] }
  0x1f   :  { %v176_v5 = vpack.c.bf16 %v116_v63, %v115_v62  ;;  %v120_v11 = vld [vmem:[%s4014_s0 + $0x2e8] sm:$0xff]  ;;  %v73_v12 = vld [vmem:[%s4014_s0 + $0x170] sm:$0xff]  ;;  %v74_v13 = vld [vmem:[%s4014_s0 + $0x178] sm:$0xff] }
  0x20   :  { %v76_v16 = vld [vmem:[%s4014_s0 + $0x188] sm:$0xff]  ;;  %v121_v20 = vld [vmem:[%s4014_s0 + $0x2f0] sm:$0xff]  ;;  %v78_v25 = vld [vmem:[%s4014_s0 + $0x198] sm:$0xff] }
  0x21   :  { %2551 = vmatpush3.bf16.msra.mxu1 %v2783_v1  ;;  %v70_v1 = vld [vmem:[%s4014_s0 + $0x158] sm:$0xff]  ;;  %v77_v24 = vld [vmem:[%s4014_s0 + $0x190] sm:$0xff]  ;;  %v3217_v32 = vld [vmem:[%s4016_s2] ss:$0 sm:$0xff] }
  0x22   :  { %2453 = vmatmul.mubr.msk.bf16.gmra.mrb[12].mxu0 %vm200_vm0, %v139_v44  ;;  %2552 = vmatprep.subr.bf16.mxu1 %v2784_v8  ;;  %v64_v44 = vld [vmem:[%s4014_s0 + $0x128] sm:$0xff]  ;;  %v153_v6 = vpack.c.bf16 %v70_v1, %v69_v0  ;;  %v157_v28 = vpack.c.bf16 %v78_v25, %v77_v24  ;;  %v125_v29 = vld [vmem:[%s4014_s0 + $0x310] sm:$0xff] }
  0x23   :  { %2456 = vmatprep.mubr.msk.bf16.mxu0 %vm200_vm0, %v140_v45  ;;  %2505 = vmatmul.mubr.msk.bf16.gmra.mrb[12].mxu1 %vm200_vm0, %v165_v4  ;;  %v172_v45 = vpack.c.bf16 %v108_v39, %v107_v38  ;;  %v150_v47 = vpack.c.bf16 %v64_v44, %v63_v43  ;;  %v72_v4 = vld [vmem:[%s4014_s0 + $0x168] sm:$0xff] }
  0x24   :  { %2508 = vmatprep.mubr.msk.bf16.mxu1 %vm200_vm0, %v166_v7  ;;  %v154_v7 = vpack.c.bf16 %v72_v4, %v71_v3 }
  0x25   :  { %2553 = vmatpush3.bf16.msra.mxu1 %v2784_v8  ;;  %v117_v8 = vld [vmem:[%s4014_s0 + $0x2d0] sm:$0xff] }
  0x26   :  { %2554 = vmatprep.subr.bf16.mxu1 %v2785_v15 }
  0x29   :  { %2555 = vmatpush3.bf16.msra.mxu1 %v2785_v15  ;;  %v75_v15 = vld [vmem:[%s4014_s0 + $0x180] sm:$0xff] }
  0x2a   :  { %2457 = vmatmul.mubr.msk.bf16.gmra.mrb[16].mxu0 %vm200_vm0, %v141_v59  ;;  %v152_v59 = vpack.c.bf16 %v68_v56, %v67_v55  ;;  %v156_v19 = vpack.c.bf16 %v76_v16, %v75_v15  ;;  %v2787_v55 = vld [vmem:[%s4017_s5 + $0x8] sm:$0xff]  }
  0x2b   :  { %2460 = vmatprep.mubr.msk.bf16.mxu0 %vm200_vm0, %v142_v60  ;;  %2509 = vmatmul.mubr.msk.bf16.gmra.mrb[16].mxu1 %vm200_vm0, %v167_v18  ;;  %v113_v60 = vld [vmem:[%s4014_s0 + $0x2b0] sm:$0xff]  ;;  %v155_v18 = vpack.c.bf16 %v74_v13, %v73_v12 }
  0x2c   :  { %2512 = vmatprep.mubr.msk.bf16.mxu1 %vm200_vm0, %v168_v21  ;;  %v175_v2 = vpack.c.bf16 %v114_v61, %v113_v60  ;;  %v122_v21 = vld [vmem:[%s4014_s0 + $0x2f8] sm:$0xff] }
  0x2d   :  { %v179_v26 = vpack.c.bf16 %v122_v21, %v121_v20  ;;  %v2788_v20 = vld [vmem:[%s4017_s5 + $0x10] sm:$0xff]  }
  0x32   :  { %2461 = vmatmul.mubr.msk.bf16.gmra.mrb[20].mxu0 %vm200_vm0, %v143_v9  ;;  %v118_v9 = vld [vmem:[%s4014_s0 + $0x2d8] sm:$0xff] }
  0x33   :  { %2464 = vmatprep.mubr.msk.bf16.mxu0 %vm200_vm0, %v144_v10  ;;  %2513 = vmatmul.mubr.msk.bf16.gmra.mrb[20].mxu1 %vm200_vm0, %v169_v30  ;;  %v119_v10 = vld [vmem:[%s4014_s0 + $0x2e0] sm:$0xff]  ;;  %v177_v14 = vpack.c.bf16 %v118_v9, %v117_v8  ;;  %v126_v30 = vld [vmem:[%s4014_s0 + $0x318] sm:$0xff] }
  0x34   :  { %2516 = vmatprep.mubr.msk.bf16.mxu1 %vm200_vm0, %v170_v33  ;;  %v178_v17 = vpack.c.bf16 %v120_v11, %v119_v10  ;;  %v181_v31 = vpack.c.bf16 %v126_v30, %v125_v29  ;;  %v2786_v33 = vld [vmem:[%s4017_s5] sm:$0xff]  }
  0x35   :  { %2656 = vmatprep.subr.bf16.mxu0 %v2786_v33 }
  0x36   :  { %2657 = vmatpush3.bf16.msra.mxu0 %v2786_v33 }
  0x37   :  { %2658 = vmatprep.subr.bf16.mxu0 %v2787_v55 }
  0x3a   :  { %2465 = vmatmul.mubr.msk.bf16.gmra.mrb[24].mxu0 %vm200_vm0, %v145_v22  ;;  %v123_v22 = vld [vmem:[%s4014_s0 + $0x300] sm:$0xff] }
  0x3b   :  { %2468 = vmatprep.mubr.msk.bf16.mxu0 %vm200_vm0, %v146_v23  ;;  %2517 = vmatmul.mubr.msk.bf16.gmra.mrb[24].mxu1 %vm200_vm0, %v171_v42  ;;  %v124_v23 = vld [vmem:[%s4014_s0 + $0x308] sm:$0xff] }
  0x3c   :  { %2520 = vmatprep.mubr.msk.bf16.mxu1 %vm200_vm0, %v172_v45  ;;  %v180_v27 = vpack.c.bf16 %v124_v23, %v123_v22  ;;  %2659 = vmatpush3.bf16.msra.mxu0 %v2787_v55 }
  0x3d   :  { %2660 = vmatprep.subr.bf16.mxu0 %v2788_v20 }
  0x40   :  { %2661 = vmatpush3.bf16.msra.mxu0 %v2788_v20 }
  0x42   :  { %2469 = vmatmul.mubr.msk.bf16.gmra.mrb[28].mxu0 %vm200_vm0, %v147_v34 }
  0x43   :  { %2472 = vmatprep.mubr.msk.bf16.mxu0 %vm200_vm0, %v148_v35  ;;  %2521 = vmatmul.mubr.msk.bf16.gmra.mrb[28].mxu1 %vm200_vm0, %v173_v54 }
  0x44   :  { %2524 = vmatprep.mubr.msk.bf16.mxu1 %vm200_vm0, %v174_v57 }
  0x4a   :  { %2473 = vmatmul.mubr.msk.bf16.gmra.mrb[32].mxu0 %vm200_vm0, %v149_v46 }
  0x4b   :  { %2476 = vmatprep.mubr.msk.bf16.mxu0 %vm200_vm0, %v150_v47  ;;  %2525 = vmatmul.mubr.msk.bf16.gmra.mrb[32].mxu1 %vm200_vm0, %v175_v2 }
  0x4c   :  { %2528 = vmatprep.mubr.msk.bf16.mxu1 %vm200_vm0, %v176_v5 }
  0x52   :  { %2477 = vmatmul.mubr.msk.bf16.gmra.mrb[36].mxu0 %vm200_vm0, %v151_v58 }
  0x53   :  { %2480 = vmatprep.mubr.msk.bf16.mxu0 %vm200_vm0, %v152_v59  ;;  %2529 = vmatmul.mubr.msk.bf16.gmra.mrb[36].mxu1 %vm200_vm0, %v177_v14 }
  0x54   :  { %2532 = vmatprep.mubr.msk.bf16.mxu1 %vm200_vm0, %v178_v17 }
  0x5a   :  { %2481 = vmatmul.mubr.msk.bf16.gmra.mrb[40].mxu0 %vm200_vm0, %v153_v6 }
  0x5b   :  { %2484 = vmatprep.mubr.msk.bf16.mxu0 %vm200_vm0, %v154_v7  ;;  %2533 = vmatmul.mubr.msk.bf16.gmra.mrb[40].mxu1 %vm200_vm0, %v179_v26 }
  0x5c   :  { %2536 = vmatprep.mubr.msk.bf16.mxu1 %vm200_vm0, %v180_v27 }
  0x62   :  { %2485 = vmatmul.mubr.msk.bf16.gmra.mrb[44].mxu0 %vm200_vm0, %v155_v18 }
  0x63   :  { %2488 = vmatprep.mubr.msk.bf16.mxu0 %vm200_vm0, %v156_v19  ;;  %2537 = vmatmul.mubr.msk.bf16.gmra.mrb[44].mxu1 %vm200_vm0, %v181_v31 }
  0x6a   :  { %2489 = vmatmul.mubr.msk.bf16.gmra.mrb[48].mxu0 %vm200_vm0, %v157_v28 }
  0xdd   :  { %v2442_v34 = vpop.f32.mrb[0].mxu0 }
  0xde   :  { %v394_v35 = vadd.f32 %v2442_v34, %v3217_v32  ;;  %v385_v36 = vpop.f32.mrb[1].mxu0  ;;  %v2494_v59 = vpop.f32.mrb[0].mxu1 }
  0xdf   :  { %v386_v37 = vadd.f32 %v3217_v32, %v385_v36  ;;  %v2443_v38 = vpop.f32.mrb[2].mxu0  ;;  %v602_v62 = vadd.f32 %v2494_v59, %v3217_v32  ;;  %v593_v63 = vpop.f32.mrb[1].mxu1 }
  0xe0   :  { %v397_v39 = vadd.f32 %v2443_v38, %v3217_v32  ;;  %v388_v40 = vpop.f32.mrb[3].mxu0  ;;  %v786_v42 = vmax.f32 %v394_v35, 0.0  ;;  %v594_v1 = vadd.f32 %v3217_v32, %v593_v63  ;;  %v2495_v2 = vpop.f32.mrb[2].mxu1 }
  0xe1   :  { %v389_v41 = vadd.f32 %v3217_v32, %v388_v40  ;;  %v784_v44 = vmax.f32 %v386_v37, 0.0  ;;  %v838_v5 = vmax.f32 %v602_v62, 0.0  ;;  %v605_v6 = vadd.f32 %v2495_v2, %v3217_v32  ;;  %v596_v7 = vpop.f32.mrb[3].mxu1 }
  0xe2   :  { %v787_v43 = vmax.f32 %v397_v39, 0.0  ;;  %v836_v10 = vmax.f32 %v594_v1, 0.0  ;;  %v597_v11 = vadd.f32 %v3217_v32, %v596_v7 }
  0xe3   :  { %v785_v45 = vmax.f32 %v389_v41, 0.0  ;;  %v839_v14 = vmax.f32 %v605_v6, 0.0 }
  0xe4   :  { %v902_v46 = vpack.c.bf16 %v787_v43, %v786_v42  ;;  %v837_v17 = vmax.f32 %v597_v11, 0.0 }
  0xe5   :  { %v901_v47 = vpack.c.bf16 %v785_v45, %v784_v44  ;;  %v2446_v48 = vpop.f32.mrb[4].mxu0  ;;  %v3241_v19 = vpack.c.bf16 %v839_v14, %v838_v5  ;;  %v2789_v14 = vld [vmem:[%s4017_s5 + $0x18] sm:$0xff]  }
  0xe6   :  { %v410_v49 = vadd.f32 %v2446_v48, %v3217_v32  ;;  %v401_v50 = vpop.f32.mrb[5].mxu0  ;;  %v3246_v23 = vpack.c.bf16 %v837_v17, %v836_v10  ;;  %v2498_v24 = vpop.f32.mrb[4].mxu1  ;;  %2662 = vmatprep.subr.bf16.mxu0 %v2789_v14 }
  0xe7   :  { %v402_v51 = vadd.f32 %v3217_v32, %v401_v50  ;;  %v2447_v52 = vpop.f32.mrb[6].mxu0  ;;  %2556 = vmatprep.mubr.bf16.mxu1 %v901_v47  ;;  %v618_v27 = vadd.f32 %v2498_v24, %v3217_v32  ;;  %v609_v28 = vpop.f32.mrb[5].mxu1  ;;  %2663 = vmatpush3.bf16.msra.mxu0 %v2789_v14 }
  0xe8   :  { %v413_v53 = vadd.f32 %v2447_v52, %v3217_v32  ;;  %v404_v54 = vpop.f32.mrb[7].mxu0  ;;  %2557 = vmatmul.mubr.bf16.vlgmr.msra.gmra.mrb[48].mxu1 %v902_v46  ;;  %v790_v57 = vmax.f32 %v410_v49, 0.0  ;;  %v610_v30 = vadd.f32 %v3217_v32, %v609_v28  ;;  %v2499_v31 = vpop.f32.mrb[6].mxu1 }
  0xe9   :  { %v405_v56 = vadd.f32 %v3217_v32, %v404_v54  ;;  %v788_v60 = vmax.f32 %v402_v51, 0.0  ;;  %v842_v35 = vmax.f32 %v618_v27, 0.0  ;;  %v621_v36 = vadd.f32 %v2499_v31, %v3217_v32  ;;  %v612_v37 = vpop.f32.mrb[7].mxu1 }
  0xea   :  { %v791_v58 = vmax.f32 %v413_v53, 0.0  ;;  %v840_v40 = vmax.f32 %v610_v30, 0.0  ;;  %v613_v41 = vadd.f32 %v3217_v32, %v612_v37 }
  0xeb   :  { %v789_v61 = vmax.f32 %v405_v56, 0.0  ;;  %v843_v44 = vmax.f32 %v621_v36, 0.0 }
  0xec   :  { %v904_v0 = vpack.c.bf16 %v791_v58, %v790_v57  ;;  %v841_v47 = vmax.f32 %v613_v41, 0.0 }
  0xed   :  { %v903_v3 = vpack.c.bf16 %v789_v61, %v788_v60  ;;  %v2450_v4 = vpop.f32.mrb[8].mxu0  ;;  %v3256_v49 = vpack.c.bf16 %v843_v44, %v842_v35 }
  0xee   :  { %v426_v8 = vadd.f32 %v2450_v4, %v3217_v32  ;;  %v417_v9 = vpop.f32.mrb[9].mxu0  ;;  %v3258_v52 = vpack.c.bf16 %v841_v47, %v840_v40  ;;  %v2502_v53 = vpop.f32.mrb[8].mxu1 }
  0xef   :  { %v418_v12 = vadd.f32 %v3217_v32, %v417_v9  ;;  %v2451_v13 = vpop.f32.mrb[10].mxu0  ;;  %2560 = vmatprep.mubr.bf16.mxu1 %v903_v3  ;;  %v634_v56 = vadd.f32 %v2502_v53, %v3217_v32  ;;  %v625_v57 = vpop.f32.mrb[9].mxu1 }
  0xf0   :  { %v429_v15 = vadd.f32 %v2451_v13, %v3217_v32  ;;  %v420_v16 = vpop.f32.mrb[11].mxu0  ;;  %2561 = vmatmul.mubr.bf16.gmra.mrb[52].mxu1 %v904_v0  ;;  %v794_v21 = vmax.f32 %v426_v8, 0.0  ;;  %v626_v59 = vadd.f32 %v3217_v32, %v625_v57  ;;  %v2503_v60 = vpop.f32.mrb[10].mxu1 }
  0xf1   :  { %v421_v18 = vadd.f32 %v3217_v32, %v420_v16  ;;  %v792_v25 = vmax.f32 %v418_v12, 0.0  ;;  %v846_v63 = vmax.f32 %v634_v56, 0.0  ;;  %v637_v0 = vadd.f32 %v2503_v60, %v3217_v32  ;;  %v628_v1 = vpop.f32.mrb[11].mxu1 }
  0xf2   :  { %v795_v22 = vmax.f32 %v429_v15, 0.0  ;;  %v844_v4 = vmax.f32 %v626_v59, 0.0  ;;  %v629_v5 = vadd.f32 %v3217_v32, %v628_v1 }
  0xf3   :  { %v793_v26 = vmax.f32 %v421_v18, 0.0  ;;  %v847_v8 = vmax.f32 %v637_v0, 0.0 }
  0xf4   :  { %v906_v29 = vpack.c.bf16 %v795_v22, %v794_v21  ;;  %v845_v11 = vmax.f32 %v629_v5, 0.0 }
  0xf5   :  { %v905_v33 = vpack.c.bf16 %v793_v26, %v792_v25  ;;  %v2454_v34 = vpop.f32.mrb[12].mxu0  ;;  %v3268_v13 = vpack.c.bf16 %v847_v8, %v846_v63 }
  0xf6   :  { %v442_v38 = vadd.f32 %v2454_v34, %v3217_v32  ;;  %v433_v39 = vpop.f32.mrb[13].mxu0  ;;  %v3273_v17 = vpack.c.bf16 %v845_v11, %v844_v4  ;;  %v2506_v18 = vpop.f32.mrb[12].mxu1 }
  0xf7   :  { %v434_v42 = vadd.f32 %v3217_v32, %v433_v39  ;;  %v2455_v43 = vpop.f32.mrb[14].mxu0  ;;  %2564 = vmatprep.mubr.bf16.mxu1 %v905_v33  ;;  %v650_v22 = vadd.f32 %v2506_v18, %v3217_v32  ;;  %v641_v24 = vpop.f32.mrb[13].mxu1 }
  0xf8   :  { %v445_v45 = vadd.f32 %v2455_v43, %v3217_v32  ;;  %v436_v46 = vpop.f32.mrb[15].mxu0  ;;  %2565 = vmatmul.mubr.bf16.gmra.mrb[56].mxu1 %v906_v29  ;;  %v798_v50 = vmax.f32 %v442_v38, 0.0  ;;  %v642_v26 = vadd.f32 %v3217_v32, %v641_v24  ;;  %v2507_v27 = vpop.f32.mrb[14].mxu1 }
  0xf9   :  { %v437_v48 = vadd.f32 %v3217_v32, %v436_v46  ;;  %v796_v54 = vmax.f32 %v434_v42, 0.0  ;;  %v850_v30 = vmax.f32 %v650_v22, 0.0  ;;  %v653_v31 = vadd.f32 %v2507_v27, %v3217_v32  ;;  %v644_v33 = vpop.f32.mrb[15].mxu1 }
  0xfa   :  { %v799_v51 = vmax.f32 %v445_v45, 0.0  ;;  %v848_v36 = vmax.f32 %v642_v26, 0.0  ;;  %v645_v37 = vadd.f32 %v3217_v32, %v644_v33 }
  0xfb   :  { %v797_v55 = vmax.f32 %v437_v48, 0.0  ;;  %v851_v40 = vmax.f32 %v653_v31, 0.0 }
  0xfc   :  { %v908_v58 = vpack.c.bf16 %v799_v51, %v798_v50  ;;  %v849_v43 = vmax.f32 %v645_v37, 0.0 }
  0xfd   :  { %v907_v61 = vpack.c.bf16 %v797_v55, %v796_v54  ;;  %v2458_v62 = vpop.f32.mrb[16].mxu0  ;;  %v3283_v45 = vpack.c.bf16 %v851_v40, %v850_v30 }
  0xfe   :  { %v458_v2 = vadd.f32 %v2458_v62, %v3217_v32  ;;  %v449_v3 = vpop.f32.mrb[17].mxu0  ;;  %v3285_v48 = vpack.c.bf16 %v849_v43, %v848_v36  ;;  %v2510_v50 = vpop.f32.mrb[16].mxu1 }
  0xff   :  { %v450_v6 = vadd.f32 %v3217_v32, %v449_v3  ;;  %v2459_v7 = vpop.f32.mrb[18].mxu0  ;;  %2568 = vmatprep.mubr.bf16.mxu1 %v907_v61  ;;  %v666_v54 = vadd.f32 %v2510_v50, %v3217_v32  ;;  %v657_v55 = vpop.f32.mrb[17].mxu1 }
 0x100   :  { %v461_v9 = vadd.f32 %v2459_v7, %v3217_v32  ;;  %v452_v10 = vpop.f32.mrb[19].mxu0  ;;  %2569 = vmatmul.mubr.bf16.gmra.mrb[60].mxu1 %v908_v58  ;;  %v802_v15 = vmax.f32 %v458_v2, 0.0  ;;  %v658_v57 = vadd.f32 %v3217_v32, %v657_v55  ;;  %v2511_v58 = vpop.f32.mrb[18].mxu1 }
 0x101   :  { %v453_v12 = vadd.f32 %v3217_v32, %v452_v10  ;;  %v800_v20 = vmax.f32 %v450_v6, 0.0  ;;  %v854_v61 = vmax.f32 %v666_v54, 0.0  ;;  %v669_v62 = vadd.f32 %v2511_v58, %v3217_v32  ;;  %v660_v63 = vpop.f32.mrb[19].mxu1  ;;  %v2790_v10 = vld [vmem:[%s4017_s5 + $0x20] sm:$0xff]  }
 0x102   :  { %v803_v16 = vmax.f32 %v461_v9, 0.0  ;;  %v852_v2 = vmax.f32 %v658_v57, 0.0  ;;  %v661_v3 = vadd.f32 %v3217_v32, %v660_v63  ;;  %2664 = vmatprep.subr.bf16.mxu0 %v2790_v10 }
 0x103   :  { %v801_v21 = vmax.f32 %v453_v12, 0.0  ;;  %v855_v6 = vmax.f32 %v669_v62, 0.0  ;;  %2665 = vmatpush3.bf16.msra.mxu0 %v2790_v10 }
 0x104   :  { %v910_v25 = vpack.c.bf16 %v803_v16, %v802_v15  ;;  %v853_v9 = vmax.f32 %v661_v3, 0.0 }
 0x105   :  { %v909_v28 = vpack.c.bf16 %v801_v21, %v800_v20  ;;  %v2462_v29 = vpop.f32.mrb[20].mxu0  ;;  %v3298_v12 = vpack.c.bf16 %v855_v6, %v854_v61 }
 0x106   :  { %v474_v34 = vadd.f32 %v2462_v29, %v3217_v32  ;;  %v465_v35 = vpop.f32.mrb[21].mxu0  ;;  %v3300_v16 = vpack.c.bf16 %v853_v9, %v852_v2  ;;  %v2514_v18 = vpop.f32.mrb[20].mxu1 }
 0x107   :  { %v466_v38 = vadd.f32 %v3217_v32, %v465_v35  ;;  %v2463_v39 = vpop.f32.mrb[22].mxu0  ;;  %2572 = vmatprep.mubr.bf16.mxu1 %v909_v28  ;;  %v682_v22 = vadd.f32 %v2514_v18, %v3217_v32  ;;  %v673_v24 = vpop.f32.mrb[21].mxu1 }
 0x108   :  { %v477_v41 = vadd.f32 %v2463_v39, %v3217_v32  ;;  %v468_v42 = vpop.f32.mrb[23].mxu0  ;;  %2573 = vmatmul.mubr.bf16.gmra.mrb[64].mxu1 %v910_v25  ;;  %v806_v46 = vmax.f32 %v474_v34, 0.0  ;;  %v674_v26 = vadd.f32 %v3217_v32, %v673_v24  ;;  %v2515_v27 = vpop.f32.mrb[22].mxu1 }
 0x109   :  { %v469_v44 = vadd.f32 %v3217_v32, %v468_v42  ;;  %v804_v51 = vmax.f32 %v466_v38, 0.0  ;;  %v858_v30 = vmax.f32 %v682_v22, 0.0  ;;  %v685_v31 = vadd.f32 %v2515_v27, %v3217_v32  ;;  %v676_v33 = vpop.f32.mrb[23].mxu1 }
 0x10a   :  { %v807_v47 = vmax.f32 %v477_v41, 0.0  ;;  %v856_v36 = vmax.f32 %v674_v26, 0.0  ;;  %v677_v37 = vadd.f32 %v3217_v32, %v676_v33 }
 0x10b   :  { %v805_v53 = vmax.f32 %v469_v44, 0.0  ;;  %v859_v40 = vmax.f32 %v685_v31, 0.0 }
 0x10c   :  { %v912_v56 = vpack.c.bf16 %v807_v47, %v806_v46  ;;  %v857_v43 = vmax.f32 %v677_v37, 0.0  ;;  %v2791_v47 = vld [vmem:[%s4017_s5 + $0x28] sm:$0xff]  }
 0x10d   :  { %v911_v59 = vpack.c.bf16 %v805_v53, %v804_v51  ;;  %v2466_v60 = vpop.f32.mrb[24].mxu0  ;;  %v3310_v46 = vpack.c.bf16 %v859_v40, %v858_v30  ;;  %2666 = vmatprep.subr.bf16.mxu0 %v2791_v47 }
 0x10e   :  { %v490_v0 = vadd.f32 %v2466_v60, %v3217_v32  ;;  %v481_v1 = vpop.f32.mrb[25].mxu0  ;;  %v3315_v53 = vpack.c.bf16 %v857_v43, %v856_v36  ;;  %v2518_v54 = vpop.f32.mrb[24].mxu1  ;;  %2667 = vmatpush3.bf16.msra.mxu0 %v2791_v47 }
 0x10f   :  { %v482_v4 = vadd.f32 %v3217_v32, %v481_v1  ;;  %v2467_v5 = vpop.f32.mrb[26].mxu0  ;;  %2576 = vmatprep.mubr.bf16.mxu1 %v911_v59  ;;  %v698_v57 = vadd.f32 %v2518_v54, %v3217_v32  ;;  %v689_v58 = vpop.f32.mrb[25].mxu1  ;;  %v2792_v54 = vld [vmem:[%s4017_s5 + $0x30] sm:$0xff]  }
 0x110   :  { %v493_v7 = vadd.f32 %v2467_v5, %v3217_v32  ;;  %v484_v8 = vpop.f32.mrb[27].mxu0  ;;  %2577 = vmatmul.mubr.bf16.gmra.mrb[68].mxu1 %v912_v56  ;;  %v810_v14 = vmax.f32 %v490_v0, 0.0  ;;  %v690_v60 = vadd.f32 %v3217_v32, %v689_v58  ;;  %v2519_v61 = vpop.f32.mrb[26].mxu1  ;;  %2668 = vmatprep.subr.bf16.mxu0 %v2792_v54 }
 0x111   :  { %v485_v11 = vadd.f32 %v3217_v32, %v484_v8  ;;  %v808_v20 = vmax.f32 %v482_v4, 0.0  ;;  %v862_v0 = vmax.f32 %v698_v57, 0.0  ;;  %v701_v1 = vadd.f32 %v2519_v61, %v3217_v32  ;;  %v692_v2 = vpop.f32.mrb[27].mxu1 }
 0x112   :  { %v811_v15 = vmax.f32 %v493_v7, 0.0  ;;  %v860_v5 = vmax.f32 %v690_v60, 0.0  ;;  %v693_v6 = vadd.f32 %v3217_v32, %v692_v2  ;;  %2669 = vmatpush3.bf16.msra.mxu0 %v2792_v54 }
 0x113   :  { %v809_v21 = vmax.f32 %v485_v11, 0.0  ;;  %v863_v9 = vmax.f32 %v701_v1, 0.0 }
 0x114   :  { %v914_v25 = vpack.c.bf16 %v811_v15, %v810_v14  ;;  %v861_v14 = vmax.f32 %v693_v6, 0.0 }
 0x115   :  { %v913_v28 = vpack.c.bf16 %v809_v21, %v808_v20  ;;  %v2470_v29 = vpop.f32.mrb[28].mxu0  ;;  %v3325_v18 = vpack.c.bf16 %v863_v9, %v862_v0 }
 0x116   :  { %v506_v34 = vadd.f32 %v2470_v29, %v3217_v32  ;;  %v497_v35 = vpop.f32.mrb[29].mxu0  ;;  %v3327_v22 = vpack.c.bf16 %v861_v14, %v860_v5  ;;  %v2522_v24 = vpop.f32.mrb[28].mxu1 }
 0x117   :  { %v498_v38 = vadd.f32 %v3217_v32, %v497_v35  ;;  %v2471_v39 = vpop.f32.mrb[30].mxu0  ;;  %2580 = vmatprep.mubr.bf16.mxu1 %v913_v28  ;;  %v714_v27 = vadd.f32 %v2522_v24, %v3217_v32  ;;  %v705_v28 = vpop.f32.mrb[29].mxu1 }
 0x118   :  { %v509_v41 = vadd.f32 %v2471_v39, %v3217_v32  ;;  %v500_v42 = vpop.f32.mrb[31].mxu0  ;;  %2581 = vmatmul.mubr.bf16.gmra.mrb[72].mxu1 %v914_v25  ;;  %v814_v50 = vmax.f32 %v506_v34, 0.0  ;;  %v706_v30 = vadd.f32 %v3217_v32, %v705_v28  ;;  %v2523_v31 = vpop.f32.mrb[30].mxu1 }
 0x119   :  { %v501_v44 = vadd.f32 %v3217_v32, %v500_v42  ;;  %v812_v55 = vmax.f32 %v498_v38, 0.0  ;;  %v866_v35 = vmax.f32 %v714_v27, 0.0  ;;  %v717_v36 = vadd.f32 %v2523_v31, %v3217_v32  ;;  %v708_v37 = vpop.f32.mrb[31].mxu1 }
 0x11a   :  { %v815_v51 = vmax.f32 %v509_v41, 0.0  ;;  %v864_v40 = vmax.f32 %v706_v30, 0.0  ;;  %v709_v41 = vadd.f32 %v3217_v32, %v708_v37 }
 0x11b   :  { %v813_v56 = vmax.f32 %v501_v44, 0.0  ;;  %v867_v44 = vmax.f32 %v717_v36, 0.0 }
 0x11c   :  { %v916_v59 = vpack.c.bf16 %v815_v51, %v814_v50  ;;  %v865_v51 = vmax.f32 %v709_v41, 0.0 }
 0x11d   :  { %v915_v62 = vpack.c.bf16 %v813_v56, %v812_v55  ;;  %v2474_v63 = vpop.f32.mrb[32].mxu0  ;;  %v2793_v55 = vld [vmem:[%s4017_s5 + $0x38] sm:$0xff]   ;;  %v3343_v57 = vpack.c.bf16 %v867_v44, %v866_v35 }
 0x11e   :  { %v522_v3 = vadd.f32 %v2474_v63, %v3217_v32  ;;  %v513_v4 = vpop.f32.mrb[33].mxu0  ;;  %v3345_v60 = vpack.c.bf16 %v865_v51, %v864_v40  ;;  %v2526_v61 = vpop.f32.mrb[32].mxu1  ;;  %2670 = vmatprep.subr.bf16.mxu0 %v2793_v55 }
 0x11f   :  { %v514_v7 = vadd.f32 %v3217_v32, %v513_v4  ;;  %v2475_v8 = vpop.f32.mrb[34].mxu0  ;;  %2584 = vmatprep.mubr.bf16.mxu1 %v915_v62  ;;  %v730_v0 = vadd.f32 %v2526_v61, %v3217_v32  ;;  %v721_v1 = vpop.f32.mrb[33].mxu1  ;;  %2671 = vmatpush3.bf16.msra.mxu0 %v2793_v55 }
 0x120   :  { %v525_v10 = vadd.f32 %v2475_v8, %v3217_v32  ;;  %v516_v11 = vpop.f32.mrb[35].mxu0  ;;  %2585 = vmatmul.mubr.bf16.gmra.mrb[76].mxu1 %v916_v59  ;;  %v818_v20 = vmax.f32 %v522_v3, 0.0  ;;  %v722_v3 = vadd.f32 %v3217_v32, %v721_v1  ;;  %v2527_v4 = vpop.f32.mrb[34].mxu1 }
 0x121   :  { %v517_v15 = vadd.f32 %v3217_v32, %v516_v11  ;;  %v816_v25 = vmax.f32 %v514_v7, 0.0  ;;  %v870_v7 = vmax.f32 %v730_v0, 0.0  ;;  %v733_v8 = vadd.f32 %v2527_v4, %v3217_v32  ;;  %v724_v9 = vpop.f32.mrb[35].mxu1 }
 0x122   :  { %v819_v21 = vmax.f32 %v525_v10, 0.0  ;;  %v868_v14 = vmax.f32 %v722_v3, 0.0 }
 0x123   :  { %v817_v26 = vmax.f32 %v517_v15, 0.0  ;;  %v725_v15 = vadd.f32 %v3217_v32, %v724_v9  ;;  %v871_v24 = vmax.f32 %v733_v8, 0.0 }
 0x124   :  { %v918_v29 = vpack.c.bf16 %v819_v21, %v818_v20 }
 0x125   :  { %v917_v33 = vpack.c.bf16 %v817_v26, %v816_v25  ;;  %v2478_v34 = vpop.f32.mrb[36].mxu0  ;;  %v869_v27 = vmax.f32 %v725_v15, 0.0 }
 0x126   :  { %v538_v38 = vadd.f32 %v2478_v34, %v3217_v32  ;;  %v529_v39 = vpop.f32.mrb[37].mxu0  ;;  %v2530_v34 = vpop.f32.mrb[36].mxu1 }
 0x127   :  { %v530_v42 = vadd.f32 %v3217_v32, %v529_v39  ;;  %v2479_v43 = vpop.f32.mrb[38].mxu0  ;;  %2588 = vmatprep.mubr.bf16.mxu1 %v917_v33  ;;  %v3357_v33 = vpack.c.bf16 %v869_v27, %v868_v14  ;;  %v746_v37 = vadd.f32 %v2530_v34, %v3217_v32 }
 0x128   :  { %v541_v47 = vadd.f32 %v2479_v43, %v3217_v32  ;;  %v532_v50 = vpop.f32.mrb[39].mxu0  ;;  %2589 = vmatmul.mubr.bf16.gmra.mrb[80].mxu1 %v918_v29  ;;  %v822_v58 = vmax.f32 %v538_v38, 0.0  ;;  %v3355_v29 = vpack.c.bf16 %v871_v24, %v870_v7  ;;  %v737_v38 = vpop.f32.mrb[37].mxu1 }
 0x129   :  { %v533_v56 = vadd.f32 %v3217_v32, %v532_v50  ;;  %v820_v62 = vmax.f32 %v530_v42, 0.0  ;;  %v738_v40 = vadd.f32 %v3217_v32, %v737_v38  ;;  %v2531_v41 = vpop.f32.mrb[38].mxu1  ;;  %v874_v44 = vmax.f32 %v746_v37, 0.0 }
 0x12a   :  { %v823_v59 = vmax.f32 %v541_v47, 0.0  ;;  %v749_v47 = vadd.f32 %v2531_v41, %v3217_v32  ;;  %v740_v50 = vpop.f32.mrb[39].mxu1 }
 0x12b   :  { %v821_v63 = vmax.f32 %v533_v56, 0.0  ;;  %v872_v55 = vmax.f32 %v738_v40, 0.0  ;;  %v741_v56 = vadd.f32 %v3217_v32, %v740_v50 }
 0x12c   :  { %v920_v2 = vpack.c.bf16 %v823_v59, %v822_v58  ;;  %v875_v61 = vmax.f32 %v749_v47, 0.0 }
 0x12d   :  { %v919_v5 = vpack.c.bf16 %v821_v63, %v820_v62  ;;  %v2482_v6 = vpop.f32.mrb[40].mxu0  ;;  %v873_v0 = vmax.f32 %v741_v56, 0.0 }
 0x12e   :  { %v554_v10 = vadd.f32 %v2482_v6, %v3217_v32  ;;  %v545_v11 = vpop.f32.mrb[41].mxu0  ;;  %v2534_v6 = vpop.f32.mrb[40].mxu1 }
 0x12f   :  { %v546_v20 = vadd.f32 %v3217_v32, %v545_v11  ;;  %v2483_v21 = vpop.f32.mrb[42].mxu0  ;;  %2592 = vmatprep.mubr.bf16.mxu1 %v919_v5  ;;  %v3369_v5 = vpack.c.bf16 %v873_v0, %v872_v55  ;;  %v762_v9 = vadd.f32 %v2534_v6, %v3217_v32 }
 0x130   :  { %v557_v25 = vadd.f32 %v2483_v21, %v3217_v32  ;;  %v548_v26 = vpop.f32.mrb[43].mxu0  ;;  %2593 = vmatmul.mubr.bf16.gmra.mrb[84].mxu1 %v920_v2  ;;  %v826_v30 = vmax.f32 %v554_v10, 0.0  ;;  %v3367_v2 = vpack.c.bf16 %v875_v61, %v874_v44  ;;  %v753_v10 = vpop.f32.mrb[41].mxu1 }
 0x131   :  { %v549_v28 = vadd.f32 %v3217_v32, %v548_v26  ;;  %v824_v35 = vmax.f32 %v546_v20, 0.0  ;;  %v754_v14 = vadd.f32 %v3217_v32, %v753_v10  ;;  %v2535_v15 = vpop.f32.mrb[42].mxu1  ;;  %v878_v24 = vmax.f32 %v762_v9, 0.0 }
 0x132   :  { %v827_v31 = vmax.f32 %v557_v25, 0.0  ;;  %v765_v25 = vadd.f32 %v2535_v15, %v3217_v32  ;;  %v756_v26 = vpop.f32.mrb[43].mxu1 }
 0x133   :  { %v825_v36 = vmax.f32 %v549_v28, 0.0 }
 0x134   :  { %v922_v39 = vpack.c.bf16 %v827_v31, %v826_v30  ;;  %v876_v30 = vmax.f32 %v754_v14, 0.0  ;;  %v757_v31 = vadd.f32 %v3217_v32, %v756_v26 }
 0x135   :  { %v921_v42 = vpack.c.bf16 %v825_v36, %v824_v35  ;;  %v2486_v43 = vpop.f32.mrb[44].mxu0  ;;  %v879_v36 = vmax.f32 %v765_v25, 0.0 }
 0x136   :  { %v570_v51 = vadd.f32 %v2486_v43, %v3217_v32  ;;  %v561_v54 = vpop.f32.mrb[45].mxu0  ;;  %v2538_v47 = vpop.f32.mrb[44].mxu1 }
 0x137   :  { %v562_v58 = vadd.f32 %v3217_v32, %v561_v54  ;;  %v2487_v59 = vpop.f32.mrb[46].mxu0  ;;  %2596 = vmatprep.mubr.bf16.mxu1 %v921_v42  ;;  %v948_v41 = vpack.c.bf16 %v879_v36, %v878_v24  ;;  %v778_v54 = vadd.f32 %v2538_v47, %v3217_v32  ;;  %v769_v55 = vpop.f32.mrb[45].mxu1 }
 0x138   :  { %v573_v62 = vadd.f32 %v2487_v59, %v3217_v32  ;;  %v564_v63 = vpop.f32.mrb[47].mxu0  ;;  %2597 = vmatmul.mubr.bf16.gmra.mrb[88].mxu1 %v922_v39  ;;  %v830_v3 = vmax.f32 %v570_v51, 0.0  ;;  %v877_v39 = vmax.f32 %v757_v31, 0.0  ;;  %v2539_v59 = vpop.f32.mrb[46].mxu1 }
 0x139   :  { %v565_v1 = vadd.f32 %v3217_v32, %v564_v63  ;;  %v828_v7 = vmax.f32 %v562_v58, 0.0  ;;  %v770_v58 = vadd.f32 %v3217_v32, %v769_v55  ;;  %v781_v63 = vadd.f32 %v2539_v59, %v3217_v32  ;;  %v772_v0 = vpop.f32.mrb[47].mxu1 }
 0x13a   :  { %v831_v4 = vmax.f32 %v573_v62, 0.0  ;;  %v947_v44 = vpack.c.bf16 %v877_v39, %v876_v30  ;;  %v882_v62 = vmax.f32 %v778_v54, 0.0 }
 0x13b   :  { %v829_v8 = vmax.f32 %v565_v1, 0.0  ;;  %v880_v1 = vmax.f32 %v770_v58, 0.0 }
 0x13c   :  { %v924_v11 = vpack.c.bf16 %v831_v4, %v830_v3  ;;  %v773_v3 = vadd.f32 %v3217_v32, %v772_v0  ;;  %v883_v4 = vmax.f32 %v781_v63, 0.0 }
 0x13d   :  { %v923_v20 = vpack.c.bf16 %v829_v8, %v828_v7  ;;  %v2490_v21 = vpop.f32.mrb[48].mxu0 }
 0x13e   :  { %v586_v27 = vadd.f32 %v2490_v21, %v3217_v32  ;;  %v577_v28 = vpop.f32.mrb[49].mxu0  ;;  %v881_v6 = vmax.f32 %v773_v3, 0.0  ;;  %v950_v7 = vpack.c.bf16 %v883_v4, %v882_v62 }
 0x13f   :  { %v578_v34 = vadd.f32 %v3217_v32, %v577_v28  ;;  %v2491_v35 = vpop.f32.mrb[50].mxu0  ;;  %2600 = vmatprep.mubr.bf16.mxu1 %v923_v20 }
 0x140   :  { %v589_v37 = vadd.f32 %v2491_v35, %v3217_v32  ;;  %v580_v38 = vpop.f32.mrb[51].mxu0  ;;  %2601 = vmatmul.mubr.bf16.gmra.mrb[92].mxu1 %v924_v11  ;;  %v834_v42 = vmax.f32 %v586_v27, 0.0  ;;  %v949_v8 = vpack.c.bf16 %v881_v6, %v880_v1 }
 0x141   :  { %v581_v40 = vadd.f32 %v3217_v32, %v580_v38  ;;  %v832_v50 = vmax.f32 %v578_v34, 0.0  ;;  %v3406_v32 = vld [vmem:[%s4018_s4] ss:$0 sm:$0xff] }
 0x142   :  { %v835_v43 = vmax.f32 %v589_v37, 0.0 }
 0x143   :  { %v833_v51 = vmax.f32 %v581_v40, 0.0 }
 0x144   :  { %v926_v56 = vpack.c.bf16 %v835_v43, %v834_v42 }
 0x145   :  { %v925_v61 = vpack.c.bf16 %v833_v51, %v832_v50 }
 0x147   :  { %2604 = vmatprep.mubr.bf16.mxu1 %v925_v61 }
 0x148   :  { %2605 = vmatmul.mubr.bf16.gmra.mrb[96].mxu1 %v926_v56 }
 0x149   :  { %2608 = vmatprep.mubr.bf16.mxu1 %v3246_v23 }
 0x150   :  { %2609 = vmatmul.mubr.bf16.gmra.mrb[100].mxu1 %v3241_v19 }
 0x151   :  { %2612 = vmatprep.mubr.bf16.mxu1 %v3258_v52 }
 0x158   :  { %2613 = vmatmul.mubr.bf16.gmra.mrb[104].mxu1 %v3256_v49 }
 0x159   :  { %2616 = vmatprep.mubr.bf16.mxu1 %v3273_v17 }
 0x160   :  { %2617 = vmatmul.mubr.bf16.gmra.mrb[108].mxu1 %v3268_v13 }
 0x161   :  { %2620 = vmatprep.mubr.bf16.mxu1 %v3285_v48 }
 0x168   :  { %2621 = vmatmul.mubr.bf16.gmra.mrb[112].mxu1 %v3283_v45 }
 0x169   :  { %2624 = vmatprep.mubr.bf16.mxu1 %v3300_v16 }
 0x170   :  { %2625 = vmatmul.mubr.bf16.gmra.mrb[116].mxu1 %v3298_v12 }
 0x171   :  { %2628 = vmatprep.mubr.bf16.mxu1 %v3315_v53 }
 0x178   :  { %2629 = vmatmul.mubr.bf16.gmra.mrb[120].mxu1 %v3310_v46 }
 0x179   :  { %2632 = vmatprep.mubr.bf16.mxu1 %v3327_v22 }
 0x180   :  { %2633 = vmatmul.mubr.bf16.gmra.mrb[124].mxu1 %v3325_v18 }
 0x181   :  { %2636 = vmatprep.mubr.bf16.mxu1 %v3345_v60 }
 0x188   :  { %2637 = vmatmul.mubr.bf16.gmra.mrb[128].mxu1 %v3343_v57 }
 0x189   :  { %2640 = vmatprep.mubr.bf16.mxu1 %v3357_v33 }
 0x190   :  { %2641 = vmatmul.mubr.bf16.gmra.mrb[132].mxu1 %v3355_v29 }
 0x191   :  { %2644 = vmatprep.mubr.bf16.mxu1 %v3369_v5 }
 0x198   :  { %2645 = vmatmul.mubr.bf16.gmra.mrb[136].mxu1 %v3367_v2 }
 0x199   :  { %2648 = vmatprep.mubr.bf16.mxu1 %v947_v44 }
 0x1a0   :  { %2649 = vmatmul.mubr.bf16.gmra.mrb[140].mxu1 %v948_v41 }
 0x1a1   :  { %2652 = vmatprep.mubr.bf16.mxu1 %v949_v8 }
 0x1a8   :  { %2653 = vmatmul.mubr.bf16.gmra.mrb[144].mxu1 %v950_v7 }
 0x1bb   :  { %v2558_v19 = vpop.f32.mrb[48].mxu1 }
 0x1bc   :  { %v1048_v23 = vadd.f32 %v2558_v19, %v3406_v32  ;;  %v1039_v49 = vpop.f32.mrb[49].mxu1 }
 0x1bd   :  { %v1040_v52 = vadd.f32 %v3406_v32, %v1039_v49  ;;  %v2559_v13 = vpop.f32.mrb[50].mxu1 }
 0x1be   :  { %v1051_v17 = vadd.f32 %v2559_v13, %v3406_v32  ;;  %v1042_v45 = vpop.f32.mrb[51].mxu1  ;;  %v1440_v12 = vmax.f32 %v1048_v23, 0.0 }
 0x1bf   :  { %v1043_v48 = vadd.f32 %v3406_v32, %v1042_v45  ;;  %v1438_v46 = vmax.f32 %v1040_v52, 0.0 }
 0x1c0   :  { %v1441_v16 = vmax.f32 %v1051_v17, 0.0 }
 0x1c1   :  { %v1439_v53 = vmax.f32 %v1043_v48, 0.0 }
 0x1c2   :  { %v1556_v18 = vpack.c.bf16 %v1441_v16, %v1440_v12 }
 0x1c3   :  { %v1555_v22 = vpack.c.bf16 %v1439_v53, %v1438_v46  ;;  %v2562_v57 = vpop.f32.mrb[52].mxu1 }
 0x1c4   :  { %v1064_v60 = vadd.f32 %v2562_v57, %v3406_v32  ;;  %v1055_v29 = vpop.f32.mrb[53].mxu1 }
 0x1c5   :  { %v1056_v33 = vadd.f32 %v3406_v32, %v1055_v29  ;;  %v2563_v2 = vpop.f32.mrb[54].mxu1  ;;  %2672 = vmatprep.mubr.bf16.mxu0 %v1555_v22 }
 0x1c6   :  { %v1067_v5 = vadd.f32 %v2563_v2, %v3406_v32  ;;  %v1058_v9 = vpop.f32.mrb[55].mxu1  ;;  %2673 = vmatmul.mubr.bf16.vlgmr.msra.gmra.mrb[52].mxu0 %v1556_v18  ;;  %v1444_v11 = vmax.f32 %v1064_v60, 0.0 }
 0x1c7   :  { %v1059_v10 = vadd.f32 %v3406_v32, %v1058_v9  ;;  %v1442_v15 = vmax.f32 %v1056_v33, 0.0 }
 0x1c8   :  { %v1445_v14 = vmax.f32 %v1067_v5, 0.0 }
 0x1c9   :  { %v1443_v20 = vmax.f32 %v1059_v10, 0.0 }
 0x1ca   :  { %v1558_v21 = vpack.c.bf16 %v1445_v14, %v1444_v11 }
 0x1cb   :  { %v1557_v24 = vpack.c.bf16 %v1443_v20, %v1442_v15  ;;  %v2566_v25 = vpop.f32.mrb[56].mxu1 }
 0x1cc   :  { %v1080_v26 = vadd.f32 %v2566_v25, %v3406_v32  ;;  %v1071_v27 = vpop.f32.mrb[57].mxu1 }
 0x1cd   :  { %v1072_v28 = vadd.f32 %v3406_v32, %v1071_v27  ;;  %v2567_v30 = vpop.f32.mrb[58].mxu1  ;;  %2676 = vmatprep.mubr.bf16.mxu0 %v1557_v24 }
 0x1ce   :  { %v1083_v31 = vadd.f32 %v2567_v30, %v3406_v32  ;;  %v1074_v34 = vpop.f32.mrb[59].mxu1  ;;  %2677 = vmatmul.mubr.bf16.gmra.mrb[56].mxu0 %v1558_v21  ;;  %v1448_v36 = vmax.f32 %v1080_v26, 0.0 }
 0x1cf   :  { %v1075_v35 = vadd.f32 %v3406_v32, %v1074_v34  ;;  %v1446_v38 = vmax.f32 %v1072_v28, 0.0 }
 0x1d0   :  { %v1449_v37 = vmax.f32 %v1083_v31, 0.0 }
 0x1d1   :  { %v1447_v39 = vmax.f32 %v1075_v35, 0.0 }
 0x1d2   :  { %v1560_v40 = vpack.c.bf16 %v1449_v37, %v1448_v36 }
 0x1d3   :  { %v1559_v41 = vpack.c.bf16 %v1447_v39, %v1446_v38  ;;  %v2570_v42 = vpop.f32.mrb[60].mxu1 }
 0x1d4   :  { %v1096_v43 = vadd.f32 %v2570_v42, %v3406_v32  ;;  %v1087_v44 = vpop.f32.mrb[61].mxu1 }
 0x1d5   :  { %v1088_v47 = vadd.f32 %v3406_v32, %v1087_v44  ;;  %v2571_v50 = vpop.f32.mrb[62].mxu1  ;;  %2680 = vmatprep.mubr.bf16.mxu0 %v1559_v41 }
 0x1d6   :  { %v1099_v51 = vadd.f32 %v2571_v50, %v3406_v32  ;;  %v1090_v54 = vpop.f32.mrb[63].mxu1  ;;  %2681 = vmatmul.mubr.bf16.gmra.mrb[60].mxu0 %v1560_v40  ;;  %v1452_v56 = vmax.f32 %v1096_v43, 0.0 }
 0x1d7   :  { %v1091_v55 = vadd.f32 %v3406_v32, %v1090_v54  ;;  %v1450_v59 = vmax.f32 %v1088_v47, 0.0 }
 0x1d8   :  { %v1453_v58 = vmax.f32 %v1099_v51, 0.0 }
 0x1d9   :  { %v1451_v61 = vmax.f32 %v1091_v55, 0.0 }
 0x1da   :  { %v1562_v62 = vpack.c.bf16 %v1453_v58, %v1452_v56 }
 0x1db   :  { %v1561_v63 = vpack.c.bf16 %v1451_v61, %v1450_v59  ;;  %v2574_v0 = vpop.f32.mrb[64].mxu1 }
 0x1dc   :  { %v1112_v1 = vadd.f32 %v2574_v0, %v3406_v32  ;;  %v1103_v3 = vpop.f32.mrb[65].mxu1 }
 0x1dd   :  { %v1104_v4 = vadd.f32 %v3406_v32, %v1103_v3  ;;  %v2575_v6 = vpop.f32.mrb[66].mxu1  ;;  %2684 = vmatprep.mubr.bf16.mxu0 %v1561_v63 }
 0x1de   :  { %v1115_v7 = vadd.f32 %v2575_v6, %v3406_v32  ;;  %v1106_v8 = vpop.f32.mrb[67].mxu1  ;;  %2685 = vmatmul.mubr.bf16.gmra.mrb[64].mxu0 %v1562_v62  ;;  %v1456_v23 = vmax.f32 %v1112_v1, 0.0 }
 0x1df   :  { %v1107_v19 = vadd.f32 %v3406_v32, %v1106_v8  ;;  %v1454_v52 = vmax.f32 %v1104_v4, 0.0 }
 0x1e0   :  { %v1457_v49 = vmax.f32 %v1115_v7, 0.0 }
 0x1e1   :  { %v1455_v13 = vmax.f32 %v1107_v19, 0.0 }
 0x1e2   :  { %v1564_v17 = vpack.c.bf16 %v1457_v49, %v1456_v23 }
 0x1e3   :  { %v1563_v45 = vpack.c.bf16 %v1455_v13, %v1454_v52  ;;  %v2578_v48 = vpop.f32.mrb[68].mxu1 }
 0x1e4   :  { %v1128_v12 = vadd.f32 %v2578_v48, %v3406_v32  ;;  %v1119_v16 = vpop.f32.mrb[69].mxu1 }
 0x1e5   :  { %v1120_v46 = vadd.f32 %v3406_v32, %v1119_v16  ;;  %v2579_v53 = vpop.f32.mrb[70].mxu1  ;;  %2688 = vmatprep.mubr.bf16.mxu0 %v1563_v45 }
 0x1e6   :  { %v1131_v18 = vadd.f32 %v2579_v53, %v3406_v32  ;;  %v1122_v22 = vpop.f32.mrb[71].mxu1  ;;  %2689 = vmatmul.mubr.bf16.gmra.mrb[68].mxu0 %v1564_v17  ;;  %v1460_v60 = vmax.f32 %v1128_v12, 0.0 }
 0x1e7   :  { %v1123_v57 = vadd.f32 %v3406_v32, %v1122_v22  ;;  %v1458_v33 = vmax.f32 %v1120_v46, 0.0 }
 0x1e8   :  { %v1461_v29 = vmax.f32 %v1131_v18, 0.0 }
 0x1e9   :  { %v1459_v2 = vmax.f32 %v1123_v57, 0.0 }
 0x1ea   :  { %v1566_v5 = vpack.c.bf16 %v1461_v29, %v1460_v60 }
 0x1eb   :  { %v1565_v9 = vpack.c.bf16 %v1459_v2, %v1458_v33  ;;  %v2582_v10 = vpop.f32.mrb[72].mxu1 }
 0x1ec   :  { %v1144_v11 = vadd.f32 %v2582_v10, %v3406_v32  ;;  %v1135_v14 = vpop.f32.mrb[73].mxu1 }
 0x1ed   :  { %v1136_v15 = vadd.f32 %v3406_v32, %v1135_v14  ;;  %v2583_v20 = vpop.f32.mrb[74].mxu1  ;;  %2692 = vmatprep.mubr.bf16.mxu0 %v1565_v9 }
 0x1ee   :  { %v1147_v21 = vadd.f32 %v2583_v20, %v3406_v32  ;;  %v1138_v24 = vpop.f32.mrb[75].mxu1  ;;  %2693 = vmatmul.mubr.bf16.gmra.mrb[72].mxu0 %v1566_v5  ;;  %v1464_v26 = vmax.f32 %v1144_v11, 0.0 }
 0x1ef   :  { %v1139_v25 = vadd.f32 %v3406_v32, %v1138_v24  ;;  %v1462_v28 = vmax.f32 %v1136_v15, 0.0 }
 0x1f0   :  { %v1465_v27 = vmax.f32 %v1147_v21, 0.0 }
 0x1f1   :  { %v1463_v30 = vmax.f32 %v1139_v25, 0.0 }
 0x1f2   :  { %v1568_v31 = vpack.c.bf16 %v1465_v27, %v1464_v26 }
 0x1f3   :  { %v1567_v34 = vpack.c.bf16 %v1463_v30, %v1462_v28  ;;  %v2586_v35 = vpop.f32.mrb[76].mxu1 }
 0x1f4   :  { %v1160_v36 = vadd.f32 %v2586_v35, %v3406_v32  ;;  %v1151_v37 = vpop.f32.mrb[77].mxu1 }
 0x1f5   :  { %v1152_v38 = vadd.f32 %v3406_v32, %v1151_v37  ;;  %v2587_v39 = vpop.f32.mrb[78].mxu1  ;;  %2696 = vmatprep.mubr.bf16.mxu0 %v1567_v34 }
 0x1f6   :  { %v1163_v40 = vadd.f32 %v2587_v39, %v3406_v32  ;;  %v1154_v41 = vpop.f32.mrb[79].mxu1  ;;  %2697 = vmatmul.mubr.bf16.gmra.mrb[76].mxu0 %v1568_v31  ;;  %v1468_v43 = vmax.f32 %v1160_v36, 0.0 }
 0x1f7   :  { %v1155_v42 = vadd.f32 %v3406_v32, %v1154_v41  ;;  %v1466_v47 = vmax.f32 %v1152_v38, 0.0 }
 0x1f8   :  { %v1469_v44 = vmax.f32 %v1163_v40, 0.0 }
 0x1f9   :  { %v1467_v50 = vmax.f32 %v1155_v42, 0.0 }
 0x1fa   :  { %v1570_v51 = vpack.c.bf16 %v1469_v44, %v1468_v43 }
 0x1fb   :  { %v1569_v54 = vpack.c.bf16 %v1467_v50, %v1466_v47  ;;  %v2590_v55 = vpop.f32.mrb[80].mxu1 }
 0x1fc   :  { %v1176_v56 = vadd.f32 %v2590_v55, %v3406_v32  ;;  %v1167_v58 = vpop.f32.mrb[81].mxu1 }
 0x1fd   :  { %v1168_v59 = vadd.f32 %v3406_v32, %v1167_v58  ;;  %v2591_v61 = vpop.f32.mrb[82].mxu1  ;;  %2700 = vmatprep.mubr.bf16.mxu0 %v1569_v54 }
 0x1fe   :  { %v1179_v62 = vadd.f32 %v2591_v61, %v3406_v32  ;;  %v1170_v63 = vpop.f32.mrb[83].mxu1  ;;  %2701 = vmatmul.mubr.bf16.gmra.mrb[80].mxu0 %v1570_v51  ;;  %v1472_v1 = vmax.f32 %v1176_v56, 0.0 }
 0x1ff   :  { %v1171_v0 = vadd.f32 %v3406_v32, %v1170_v63  ;;  %v1470_v4 = vmax.f32 %v1168_v59, 0.0 }
 0x200   :  { %v1473_v3 = vmax.f32 %v1179_v62, 0.0 }
 0x201   :  { %v1471_v6 = vmax.f32 %v1171_v0, 0.0 }
 0x202   :  { %v1572_v7 = vpack.c.bf16 %v1473_v3, %v1472_v1 }
 0x203   :  { %v1571_v8 = vpack.c.bf16 %v1471_v6, %v1470_v4  ;;  %v2594_v19 = vpop.f32.mrb[84].mxu1 }
 0x204   :  { %v1192_v23 = vadd.f32 %v2594_v19, %v3406_v32  ;;  %v1183_v49 = vpop.f32.mrb[85].mxu1 }
 0x205   :  { %v1184_v52 = vadd.f32 %v3406_v32, %v1183_v49  ;;  %v2595_v13 = vpop.f32.mrb[86].mxu1  ;;  %2704 = vmatprep.mubr.bf16.mxu0 %v1571_v8 }
 0x206   :  { %v1195_v17 = vadd.f32 %v2595_v13, %v3406_v32  ;;  %v1186_v45 = vpop.f32.mrb[87].mxu1  ;;  %2705 = vmatmul.mubr.bf16.gmra.mrb[84].mxu0 %v1572_v7  ;;  %v1476_v12 = vmax.f32 %v1192_v23, 0.0 }
 0x207   :  { %v1187_v48 = vadd.f32 %v3406_v32, %v1186_v45  ;;  %v1474_v46 = vmax.f32 %v1184_v52, 0.0 }
 0x208   :  { %v1477_v16 = vmax.f32 %v1195_v17, 0.0 }
 0x209   :  { %v1475_v53 = vmax.f32 %v1187_v48, 0.0 }
 0x20a   :  { %v1574_v18 = vpack.c.bf16 %v1477_v16, %v1476_v12 }
 0x20b   :  { %v1573_v22 = vpack.c.bf16 %v1475_v53, %v1474_v46  ;;  %v2598_v57 = vpop.f32.mrb[88].mxu1 }
 0x20c   :  { %v1208_v60 = vadd.f32 %v2598_v57, %v3406_v32  ;;  %v1199_v29 = vpop.f32.mrb[89].mxu1 }
 0x20d   :  { %v1200_v33 = vadd.f32 %v3406_v32, %v1199_v29  ;;  %v2599_v2 = vpop.f32.mrb[90].mxu1  ;;  %2708 = vmatprep.mubr.bf16.mxu0 %v1573_v22 }
 0x20e   :  { %v1211_v5 = vadd.f32 %v2599_v2, %v3406_v32  ;;  %v1202_v9 = vpop.f32.mrb[91].mxu1  ;;  %2709 = vmatmul.mubr.bf16.gmra.mrb[88].mxu0 %v1574_v18  ;;  %v1480_v11 = vmax.f32 %v1208_v60, 0.0 }
 0x20f   :  { %v1203_v10 = vadd.f32 %v3406_v32, %v1202_v9  ;;  %v1478_v15 = vmax.f32 %v1200_v33, 0.0 }
 0x210   :  { %v1481_v14 = vmax.f32 %v1211_v5, 0.0 }
 0x211   :  { %v1479_v20 = vmax.f32 %v1203_v10, 0.0 }
 0x212   :  { %v1576_v21 = vpack.c.bf16 %v1481_v14, %v1480_v11 }
 0x213   :  { %v1575_v24 = vpack.c.bf16 %v1479_v20, %v1478_v15  ;;  %v2602_v25 = vpop.f32.mrb[92].mxu1 }
 0x214   :  { %v1224_v26 = vadd.f32 %v2602_v25, %v3406_v32  ;;  %v1215_v27 = vpop.f32.mrb[93].mxu1 }
 0x215   :  { %v1216_v28 = vadd.f32 %v3406_v32, %v1215_v27  ;;  %v2603_v30 = vpop.f32.mrb[94].mxu1  ;;  %2712 = vmatprep.mubr.bf16.mxu0 %v1575_v24 }
 0x216   :  { %v1227_v31 = vadd.f32 %v2603_v30, %v3406_v32  ;;  %v1218_v34 = vpop.f32.mrb[95].mxu1  ;;  %2713 = vmatmul.mubr.bf16.gmra.mrb[92].mxu0 %v1576_v21  ;;  %v1484_v36 = vmax.f32 %v1224_v26, 0.0 }
 0x217   :  { %v1219_v35 = vadd.f32 %v3406_v32, %v1218_v34  ;;  %v1482_v38 = vmax.f32 %v1216_v28, 0.0 }
 0x218   :  { %v1485_v37 = vmax.f32 %v1227_v31, 0.0 }
 0x219   :  { %v1483_v39 = vmax.f32 %v1219_v35, 0.0 }
 0x21a   :  { %v1578_v40 = vpack.c.bf16 %v1485_v37, %v1484_v36 }
 0x21b   :  { %v1577_v41 = vpack.c.bf16 %v1483_v39, %v1482_v38  ;;  %v2606_v42 = vpop.f32.mrb[96].mxu1 }
 0x21c   :  { %v1240_v43 = vadd.f32 %v2606_v42, %v3406_v32  ;;  %v1231_v44 = vpop.f32.mrb[97].mxu1 }
 0x21d   :  { %v1232_v47 = vadd.f32 %v3406_v32, %v1231_v44  ;;  %v2607_v50 = vpop.f32.mrb[98].mxu1  ;;  %2716 = vmatprep.mubr.bf16.mxu0 %v1577_v41 }
 0x21e   :  { %v1243_v51 = vadd.f32 %v2607_v50, %v3406_v32  ;;  %v1234_v54 = vpop.f32.mrb[99].mxu1  ;;  %2717 = vmatmul.mubr.bf16.gmra.mrb[96].mxu0 %v1578_v40  ;;  %v1488_v56 = vmax.f32 %v1240_v43, 0.0 }
 0x21f   :  { %v1235_v55 = vadd.f32 %v3406_v32, %v1234_v54  ;;  %v1486_v59 = vmax.f32 %v1232_v47, 0.0 }
 0x220   :  { %v1489_v58 = vmax.f32 %v1243_v51, 0.0 }
 0x221   :  { %v1487_v61 = vmax.f32 %v1235_v55, 0.0 }
 0x222   :  { %v1580_v62 = vpack.c.bf16 %v1489_v58, %v1488_v56 }
 0x223   :  { %v1579_v63 = vpack.c.bf16 %v1487_v61, %v1486_v59  ;;  %v2610_v0 = vpop.f32.mrb[100].mxu1 }
 0x224   :  { %v1256_v1 = vadd.f32 %v2610_v0, %v3406_v32  ;;  %v1247_v3 = vpop.f32.mrb[101].mxu1 }
 0x225   :  { %v1248_v4 = vadd.f32 %v3406_v32, %v1247_v3  ;;  %v2611_v6 = vpop.f32.mrb[102].mxu1  ;;  %2720 = vmatprep.mubr.bf16.mxu0 %v1579_v63 }
 0x226   :  { %v1259_v7 = vadd.f32 %v2611_v6, %v3406_v32  ;;  %v1250_v8 = vpop.f32.mrb[103].mxu1  ;;  %2721 = vmatmul.mubr.bf16.gmra.mrb[100].mxu0 %v1580_v62  ;;  %v1492_v23 = vmax.f32 %v1256_v1, 0.0 }
 0x227   :  { %v1251_v19 = vadd.f32 %v3406_v32, %v1250_v8  ;;  %v1490_v52 = vmax.f32 %v1248_v4, 0.0 }
 0x228   :  { %v1493_v49 = vmax.f32 %v1259_v7, 0.0 }
 0x229   :  { %v1491_v13 = vmax.f32 %v1251_v19, 0.0 }
 0x22a   :  { %v1582_v17 = vpack.c.bf16 %v1493_v49, %v1492_v23 }
 0x22b   :  { %v1581_v45 = vpack.c.bf16 %v1491_v13, %v1490_v52  ;;  %v2614_v48 = vpop.f32.mrb[104].mxu1 }
 0x22c   :  { %v1272_v12 = vadd.f32 %v2614_v48, %v3406_v32  ;;  %v1263_v16 = vpop.f32.mrb[105].mxu1 }
 0x22d   :  { %v1264_v46 = vadd.f32 %v3406_v32, %v1263_v16  ;;  %v2615_v53 = vpop.f32.mrb[106].mxu1  ;;  %2724 = vmatprep.mubr.bf16.mxu0 %v1581_v45 }
 0x22e   :  { %v1275_v18 = vadd.f32 %v2615_v53, %v3406_v32  ;;  %v1266_v22 = vpop.f32.mrb[107].mxu1  ;;  %2725 = vmatmul.mubr.bf16.gmra.mrb[104].mxu0 %v1582_v17  ;;  %v1496_v60 = vmax.f32 %v1272_v12, 0.0 }
 0x22f   :  { %v1267_v57 = vadd.f32 %v3406_v32, %v1266_v22  ;;  %v1494_v33 = vmax.f32 %v1264_v46, 0.0 }
 0x230   :  { %v1497_v29 = vmax.f32 %v1275_v18, 0.0 }
 0x231   :  { %v1495_v2 = vmax.f32 %v1267_v57, 0.0 }
 0x232   :  { %v1584_v5 = vpack.c.bf16 %v1497_v29, %v1496_v60 }
 0x233   :  { %v1583_v9 = vpack.c.bf16 %v1495_v2, %v1494_v33  ;;  %v2618_v10 = vpop.f32.mrb[108].mxu1 }
 0x234   :  { %v1288_v11 = vadd.f32 %v2618_v10, %v3406_v32  ;;  %v1279_v14 = vpop.f32.mrb[109].mxu1 }
 0x235   :  { %v1280_v15 = vadd.f32 %v3406_v32, %v1279_v14  ;;  %v2619_v20 = vpop.f32.mrb[110].mxu1  ;;  %2728 = vmatprep.mubr.bf16.mxu0 %v1583_v9 }
 0x236   :  { %v1291_v21 = vadd.f32 %v2619_v20, %v3406_v32  ;;  %v1282_v24 = vpop.f32.mrb[111].mxu1  ;;  %2729 = vmatmul.mubr.bf16.gmra.mrb[108].mxu0 %v1584_v5  ;;  %v1500_v26 = vmax.f32 %v1288_v11, 0.0 }
 0x237   :  { %v1283_v25 = vadd.f32 %v3406_v32, %v1282_v24  ;;  %v1498_v28 = vmax.f32 %v1280_v15, 0.0 }
 0x238   :  { %v1501_v27 = vmax.f32 %v1291_v21, 0.0 }
 0x239   :  { %v1499_v30 = vmax.f32 %v1283_v25, 0.0 }
 0x23a   :  { %v1586_v31 = vpack.c.bf16 %v1501_v27, %v1500_v26 }
 0x23b   :  { %v1585_v34 = vpack.c.bf16 %v1499_v30, %v1498_v28  ;;  %v2622_v35 = vpop.f32.mrb[112].mxu1 }
 0x23c   :  { %v1304_v36 = vadd.f32 %v2622_v35, %v3406_v32  ;;  %v1295_v37 = vpop.f32.mrb[113].mxu1 }
 0x23d   :  { %v1296_v38 = vadd.f32 %v3406_v32, %v1295_v37  ;;  %v2623_v39 = vpop.f32.mrb[114].mxu1  ;;  %2732 = vmatprep.mubr.bf16.mxu0 %v1585_v34 }
 0x23e   :  { %v1307_v40 = vadd.f32 %v2623_v39, %v3406_v32  ;;  %v1298_v41 = vpop.f32.mrb[115].mxu1  ;;  %2733 = vmatmul.mubr.bf16.gmra.mrb[112].mxu0 %v1586_v31  ;;  %v1504_v43 = vmax.f32 %v1304_v36, 0.0 }
 0x23f   :  { %v1299_v42 = vadd.f32 %v3406_v32, %v1298_v41  ;;  %v1502_v47 = vmax.f32 %v1296_v38, 0.0 }
 0x240   :  { %v1505_v44 = vmax.f32 %v1307_v40, 0.0 }
 0x241   :  { %v1503_v50 = vmax.f32 %v1299_v42, 0.0 }
 0x242   :  { %v1588_v51 = vpack.c.bf16 %v1505_v44, %v1504_v43 }
 0x243   :  { %v1587_v54 = vpack.c.bf16 %v1503_v50, %v1502_v47  ;;  %v2626_v55 = vpop.f32.mrb[116].mxu1 }
 0x244   :  { %v1320_v56 = vadd.f32 %v2626_v55, %v3406_v32  ;;  %v1311_v58 = vpop.f32.mrb[117].mxu1 }
 0x245   :  { %v1312_v59 = vadd.f32 %v3406_v32, %v1311_v58  ;;  %v2627_v61 = vpop.f32.mrb[118].mxu1  ;;  %2736 = vmatprep.mubr.bf16.mxu0 %v1587_v54 }
 0x246   :  { %v1323_v62 = vadd.f32 %v2627_v61, %v3406_v32  ;;  %v1314_v63 = vpop.f32.mrb[119].mxu1  ;;  %2737 = vmatmul.mubr.bf16.gmra.mrb[116].mxu0 %v1588_v51  ;;  %v1508_v1 = vmax.f32 %v1320_v56, 0.0 }
 0x247   :  { %v1315_v0 = vadd.f32 %v3406_v32, %v1314_v63  ;;  %v1506_v4 = vmax.f32 %v1312_v59, 0.0 }
 0x248   :  { %v1509_v3 = vmax.f32 %v1323_v62, 0.0 }
 0x249   :  { %v1507_v6 = vmax.f32 %v1315_v0, 0.0 }
 0x24a   :  { %v1590_v7 = vpack.c.bf16 %v1509_v3, %v1508_v1 }
 0x24b   :  { %v1589_v8 = vpack.c.bf16 %v1507_v6, %v1506_v4  ;;  %v2630_v19 = vpop.f32.mrb[120].mxu1 }
 0x24c   :  { %v1336_v23 = vadd.f32 %v2630_v19, %v3406_v32  ;;  %v1327_v49 = vpop.f32.mrb[121].mxu1 }
 0x24d   :  { %v1328_v52 = vadd.f32 %v3406_v32, %v1327_v49  ;;  %v2631_v13 = vpop.f32.mrb[122].mxu1  ;;  %2740 = vmatprep.mubr.bf16.mxu0 %v1589_v8 }
 0x24e   :  { %v1339_v17 = vadd.f32 %v2631_v13, %v3406_v32  ;;  %v1330_v45 = vpop.f32.mrb[123].mxu1  ;;  %2741 = vmatmul.mubr.bf16.gmra.mrb[120].mxu0 %v1590_v7  ;;  %v1512_v12 = vmax.f32 %v1336_v23, 0.0 }
 0x24f   :  { %v1331_v48 = vadd.f32 %v3406_v32, %v1330_v45  ;;  %v1510_v46 = vmax.f32 %v1328_v52, 0.0 }
 0x250   :  { %v1513_v16 = vmax.f32 %v1339_v17, 0.0 }
 0x251   :  { %v1511_v53 = vmax.f32 %v1331_v48, 0.0 }
 0x252   :  { %v1592_v18 = vpack.c.bf16 %v1513_v16, %v1512_v12 }
 0x253   :  { %v1591_v22 = vpack.c.bf16 %v1511_v53, %v1510_v46  ;;  %v2634_v57 = vpop.f32.mrb[124].mxu1 }
 0x254   :  { %v1352_v60 = vadd.f32 %v2634_v57, %v3406_v32  ;;  %v1343_v29 = vpop.f32.mrb[125].mxu1 }
 0x255   :  { %v1344_v33 = vadd.f32 %v3406_v32, %v1343_v29  ;;  %v2635_v2 = vpop.f32.mrb[126].mxu1  ;;  %2744 = vmatprep.mubr.bf16.mxu0 %v1591_v22 }
 0x256   :  { %v1355_v5 = vadd.f32 %v2635_v2, %v3406_v32  ;;  %v1346_v9 = vpop.f32.mrb[127].mxu1  ;;  %2745 = vmatmul.mubr.bf16.gmra.mrb[124].mxu0 %v1592_v18  ;;  %v1516_v11 = vmax.f32 %v1352_v60, 0.0 }
 0x257   :  { %v1347_v10 = vadd.f32 %v3406_v32, %v1346_v9  ;;  %v1514_v15 = vmax.f32 %v1344_v33, 0.0 }
 0x258   :  { %v1517_v14 = vmax.f32 %v1355_v5, 0.0 }
 0x259   :  { %v1515_v20 = vmax.f32 %v1347_v10, 0.0 }
 0x25a   :  { %v1594_v21 = vpack.c.bf16 %v1517_v14, %v1516_v11 }
 0x25b   :  { %v1593_v24 = vpack.c.bf16 %v1515_v20, %v1514_v15  ;;  %v2638_v25 = vpop.f32.mrb[128].mxu1 }
 0x25c   :  { %v1368_v26 = vadd.f32 %v2638_v25, %v3406_v32  ;;  %v1359_v27 = vpop.f32.mrb[129].mxu1 }
 0x25d   :  { %v1360_v28 = vadd.f32 %v3406_v32, %v1359_v27  ;;  %v2639_v30 = vpop.f32.mrb[130].mxu1  ;;  %2748 = vmatprep.mubr.bf16.mxu0 %v1593_v24 }
 0x25e   :  { %v1371_v31 = vadd.f32 %v2639_v30, %v3406_v32  ;;  %v1362_v34 = vpop.f32.mrb[131].mxu1  ;;  %2749 = vmatmul.mubr.bf16.gmra.mrb[128].mxu0 %v1594_v21  ;;  %v1520_v36 = vmax.f32 %v1368_v26, 0.0 }
 0x25f   :  { %v1363_v35 = vadd.f32 %v3406_v32, %v1362_v34  ;;  %v1518_v38 = vmax.f32 %v1360_v28, 0.0 }
 0x260   :  { %v1521_v37 = vmax.f32 %v1371_v31, 0.0 }
 0x261   :  { %v1519_v39 = vmax.f32 %v1363_v35, 0.0  ;;  %v3511_v35 = vld [vmem:[%s4019_s6] ss:$0 sm:$0xff] }
 0x262   :  { %v1596_v40 = vpack.c.bf16 %v1521_v37, %v1520_v36 }
 0x263   :  { %v1595_v41 = vpack.c.bf16 %v1519_v39, %v1518_v38  ;;  %v2642_v42 = vpop.f32.mrb[132].mxu1 }
 0x264   :  { %v1384_v43 = vadd.f32 %v2642_v42, %v3406_v32  ;;  %v1375_v44 = vpop.f32.mrb[133].mxu1 }
 0x265   :  { %v1376_v47 = vadd.f32 %v3406_v32, %v1375_v44  ;;  %v2643_v50 = vpop.f32.mrb[134].mxu1  ;;  %2752 = vmatprep.mubr.bf16.mxu0 %v1595_v41 }
 0x266   :  { %v1387_v51 = vadd.f32 %v2643_v50, %v3406_v32  ;;  %v1378_v54 = vpop.f32.mrb[135].mxu1  ;;  %2753 = vmatmul.mubr.bf16.gmra.mrb[132].mxu0 %v1596_v40  ;;  %v1524_v56 = vmax.f32 %v1384_v43, 0.0 }
 0x267   :  { %v1379_v55 = vadd.f32 %v3406_v32, %v1378_v54  ;;  %v1522_v59 = vmax.f32 %v1376_v47, 0.0 }
 0x268   :  { %v1525_v58 = vmax.f32 %v1387_v51, 0.0 }
 0x269   :  { %v1523_v61 = vmax.f32 %v1379_v55, 0.0 }
 0x26a   :  { %v1598_v62 = vpack.c.bf16 %v1525_v58, %v1524_v56 }
 0x26b   :  { %v1597_v63 = vpack.c.bf16 %v1523_v61, %v1522_v59  ;;  %v2646_v0 = vpop.f32.mrb[136].mxu1 }
 0x26c   :  { %v1400_v1 = vadd.f32 %v2646_v0, %v3406_v32  ;;  %v1391_v3 = vpop.f32.mrb[137].mxu1 }
 0x26d   :  { %v1392_v4 = vadd.f32 %v3406_v32, %v1391_v3  ;;  %v2647_v6 = vpop.f32.mrb[138].mxu1  ;;  %2756 = vmatprep.mubr.bf16.mxu0 %v1597_v63 }
 0x26e   :  { %v1403_v7 = vadd.f32 %v2647_v6, %v3406_v32  ;;  %v1394_v8 = vpop.f32.mrb[139].mxu1  ;;  %2757 = vmatmul.mubr.bf16.gmra.mrb[136].mxu0 %v1598_v62  ;;  %v1528_v23 = vmax.f32 %v1400_v1, 0.0 }
 0x26f   :  { %v1395_v19 = vadd.f32 %v3406_v32, %v1394_v8  ;;  %v1526_v52 = vmax.f32 %v1392_v4, 0.0 }
 0x270   :  { %v1529_v49 = vmax.f32 %v1403_v7, 0.0 }
 0x271   :  { %v1527_v13 = vmax.f32 %v1395_v19, 0.0 }
 0x272   :  { %v1600_v17 = vpack.c.bf16 %v1529_v49, %v1528_v23 }
 0x273   :  { %v1599_v45 = vpack.c.bf16 %v1527_v13, %v1526_v52  ;;  %v2650_v48 = vpop.f32.mrb[140].mxu1 }
 0x274   :  { %v1416_v12 = vadd.f32 %v2650_v48, %v3406_v32  ;;  %v1407_v16 = vpop.f32.mrb[141].mxu1 }
 0x275   :  { %v1408_v46 = vadd.f32 %v3406_v32, %v1407_v16  ;;  %v2651_v53 = vpop.f32.mrb[142].mxu1  ;;  %2760 = vmatprep.mubr.bf16.mxu0 %v1599_v45 }
 0x276   :  { %v1419_v18 = vadd.f32 %v2651_v53, %v3406_v32  ;;  %v1410_v22 = vpop.f32.mrb[143].mxu1  ;;  %2761 = vmatmul.mubr.bf16.gmra.mrb[140].mxu0 %v1600_v17  ;;  %v1532_v60 = vmax.f32 %v1416_v12, 0.0 }
 0x277   :  { %v1411_v57 = vadd.f32 %v3406_v32, %v1410_v22  ;;  %v1530_v33 = vmax.f32 %v1408_v46, 0.0 }
 0x278   :  { %v1533_v29 = vmax.f32 %v1419_v18, 0.0 }
 0x279   :  { %v1531_v2 = vmax.f32 %v1411_v57, 0.0 }
 0x27a   :  { %v1602_v5 = vpack.c.bf16 %v1533_v29, %v1532_v60 }
 0x27b   :  { %v1601_v9 = vpack.c.bf16 %v1531_v2, %v1530_v33  ;;  %v2654_v10 = vpop.f32.mrb[144].mxu1 }
 0x27c   :  { %v1432_v11 = vadd.f32 %v2654_v10, %v3406_v32  ;;  %v1423_v14 = vpop.f32.mrb[145].mxu1 }
 0x27d   :  { %v1424_v15 = vadd.f32 %v3406_v32, %v1423_v14  ;;  %v2655_v20 = vpop.f32.mrb[146].mxu1  ;;  %2764 = vmatprep.mubr.bf16.mxu0 %v1601_v9 }
 0x27e   :  { %v1435_v21 = vadd.f32 %v2655_v20, %v3406_v32  ;;  %v1426_v24 = vpop.f32.mrb[147].mxu1  ;;  %2765 = vmatmul.mubr.bf16.gmra.mrb[144].mxu0 %v1602_v5  ;;  %v1536_v26 = vmax.f32 %v1432_v11, 0.0 }
 0x27f   :  { %v1427_v25 = vadd.f32 %v3406_v32, %v1426_v24  ;;  %v1534_v28 = vmax.f32 %v1424_v15, 0.0 }
 0x280   :  { %v1537_v27 = vmax.f32 %v1435_v21, 0.0 }
 0x281   :  { %v1535_v30 = vmax.f32 %v1427_v25, 0.0 }
 0x282   :  { %v1604_v31 = vpack.c.bf16 %v1537_v27, %v1536_v26 }
 0x283   :  { %v1603_v34 = vpack.c.bf16 %v1535_v30, %v1534_v28 }
 0x285   :  { %2768 = vmatprep.mubr.bf16.mxu0 %v1603_v34 }
 0x286   :  { %2769 = vmatmul.mubr.bf16.gmra.mrb[148].mxu0 %v1604_v31 }
 0x299   :  { %v2674_v36 = vpop.f32.mrb[52].mxu0 }
 0x29a   :  { %v1702_v37 = vadd.f32 %v2674_v36, %v3511_v35  ;;  %v1693_v38 = vpop.f32.mrb[53].mxu0 }
 0x29b   :  { %v1694_v32 = vadd.f32 %v3511_v35, %v1693_v38  ;;  %v2675_v39 = vpop.f32.mrb[54].mxu0 }
 0x29c   :  { %2095 = vst.msk [vmem:[%s4020_s7 + $0x10] sm:$0xff] %vm2092_vm1, %v1702_v37  ;;  %v1705_v40 = vadd.f32 %v2675_v39, %v3511_v35  ;;  %v1696_v41 = vpop.f32.mrb[55].mxu0 }
 0x29d   :  { %2093 = vst.msk [vmem:[%s4020_s7] sm:$0xff] %vm2092_vm1, %v1694_v32  ;;  %v1697_v42 = vadd.f32 %v3511_v35, %v1696_v41 }
 0x29e   :  { %2096 = vst.msk [vmem:[%s4020_s7 + $0x18] sm:$0xff] %vm2092_vm1, %v1705_v40 }
 0x29f   :  { %2094 = vst.msk [vmem:[%s4020_s7 + $0x8] sm:$0xff] %vm2092_vm1, %v1697_v42 }
 0x2a1   :  { %v2678_v43 = vpop.f32.mrb[56].mxu0 }
 0x2a2   :  { %v1718_v44 = vadd.f32 %v2678_v43, %v3511_v35  ;;  %v1709_v47 = vpop.f32.mrb[57].mxu0 }
 0x2a3   :  { %v1710_v50 = vadd.f32 %v3511_v35, %v1709_v47  ;;  %v2679_v51 = vpop.f32.mrb[58].mxu0 }
 0x2a4   :  { %2099 = vst.msk [vmem:[%s4020_s7 + $0x30] sm:$0xff] %vm2092_vm1, %v1718_v44  ;;  %v1721_v54 = vadd.f32 %v2679_v51, %v3511_v35  ;;  %v1712_v55 = vpop.f32.mrb[59].mxu0 }
 0x2a5   :  { %2097 = vst.msk [vmem:[%s4020_s7 + $0x20] sm:$0xff] %vm2092_vm1, %v1710_v50  ;;  %v1713_v56 = vadd.f32 %v3511_v35, %v1712_v55 }
 0x2a6   :  { %2100 = vst.msk [vmem:[%s4020_s7 + $0x38] sm:$0xff] %vm2092_vm1, %v1721_v54 }
 0x2a7   :  { %2098 = vst.msk [vmem:[%s4020_s7 + $0x28] sm:$0xff] %vm2092_vm1, %v1713_v56 }
 0x2a9   :  { %v2682_v58 = vpop.f32.mrb[60].mxu0 }
 0x2aa   :  { %v1734_v59 = vadd.f32 %v2682_v58, %v3511_v35  ;;  %v1725_v61 = vpop.f32.mrb[61].mxu0 }
 0x2ab   :  { %v1726_v62 = vadd.f32 %v3511_v35, %v1725_v61  ;;  %v2683_v63 = vpop.f32.mrb[62].mxu0 }
 0x2ac   :  { %2103 = vst.msk [vmem:[%s4020_s7 + $0x50] sm:$0xff] %vm2092_vm1, %v1734_v59  ;;  %v1737_v0 = vadd.f32 %v2683_v63, %v3511_v35  ;;  %v1728_v1 = vpop.f32.mrb[63].mxu0 }
 0x2ad   :  { %2101 = vst.msk [vmem:[%s4020_s7 + $0x40] sm:$0xff] %vm2092_vm1, %v1726_v62  ;;  %v1729_v3 = vadd.f32 %v3511_v35, %v1728_v1 }
 0x2ae   :  { %2104 = vst.msk [vmem:[%s4020_s7 + $0x58] sm:$0xff] %vm2092_vm1, %v1737_v0 }
 0x2af   :  { %2102 = vst.msk [vmem:[%s4020_s7 + $0x48] sm:$0xff] %vm2092_vm1, %v1729_v3 }
 0x2b1   :  { %v2686_v4 = vpop.f32.mrb[64].mxu0 }
 0x2b2   :  { %v1750_v6 = vadd.f32 %v2686_v4, %v3511_v35  ;;  %v1741_v7 = vpop.f32.mrb[65].mxu0 }
 0x2b3   :  { %v1742_v8 = vadd.f32 %v3511_v35, %v1741_v7  ;;  %v2687_v19 = vpop.f32.mrb[66].mxu0 }
 0x2b4   :  { %2107 = vst.msk [vmem:[%s4020_s7 + $0x70] sm:$0xff] %vm2092_vm1, %v1750_v6  ;;  %v1753_v23 = vadd.f32 %v2687_v19, %v3511_v35  ;;  %v1744_v49 = vpop.f32.mrb[67].mxu0 }
 0x2b5   :  { %2105 = vst.msk [vmem:[%s4020_s7 + $0x60] sm:$0xff] %vm2092_vm1, %v1742_v8  ;;  %v1745_v52 = vadd.f32 %v3511_v35, %v1744_v49 }
 0x2b6   :  { %2108 = vst.msk [vmem:[%s4020_s7 + $0x78] sm:$0xff] %vm2092_vm1, %v1753_v23 }
 0x2b7   :  { %2106 = vst.msk [vmem:[%s4020_s7 + $0x68] sm:$0xff] %vm2092_vm1, %v1745_v52 }
 0x2b9   :  { %v2690_v13 = vpop.f32.mrb[68].mxu0 }
 0x2ba   :  { %v1766_v17 = vadd.f32 %v2690_v13, %v3511_v35  ;;  %v1757_v45 = vpop.f32.mrb[69].mxu0 }
 0x2bb   :  { %v1758_v48 = vadd.f32 %v3511_v35, %v1757_v45  ;;  %v2691_v12 = vpop.f32.mrb[70].mxu0 }
 0x2bc   :  { %2111 = vst.msk [vmem:[%s4020_s7 + $0x90] sm:$0xff] %vm2092_vm1, %v1766_v17  ;;  %v1769_v16 = vadd.f32 %v2691_v12, %v3511_v35  ;;  %v1760_v46 = vpop.f32.mrb[71].mxu0 }
 0x2bd   :  { %2109 = vst.msk [vmem:[%s4020_s7 + $0x80] sm:$0xff] %vm2092_vm1, %v1758_v48  ;;  %v1761_v53 = vadd.f32 %v3511_v35, %v1760_v46 }
 0x2be   :  { %2112 = vst.msk [vmem:[%s4020_s7 + $0x98] sm:$0xff] %vm2092_vm1, %v1769_v16 }
 0x2bf   :  { %2110 = vst.msk [vmem:[%s4020_s7 + $0x88] sm:$0xff] %vm2092_vm1, %v1761_v53 }
 0x2c1   :  { %v2694_v18 = vpop.f32.mrb[72].mxu0 }
 0x2c2   :  { %v1782_v22 = vadd.f32 %v2694_v18, %v3511_v35  ;;  %v1773_v57 = vpop.f32.mrb[73].mxu0 }
 0x2c3   :  { %v1774_v60 = vadd.f32 %v3511_v35, %v1773_v57  ;;  %v2695_v29 = vpop.f32.mrb[74].mxu0 }
 0x2c4   :  { %2115 = vst.msk [vmem:[%s4020_s7 + $0xb0] sm:$0xff] %vm2092_vm1, %v1782_v22  ;;  %v1785_v33 = vadd.f32 %v2695_v29, %v3511_v35  ;;  %v1776_v2 = vpop.f32.mrb[75].mxu0 }
 0x2c5   :  { %2113 = vst.msk [vmem:[%s4020_s7 + $0xa0] sm:$0xff] %vm2092_vm1, %v1774_v60  ;;  %v1777_v5 = vadd.f32 %v3511_v35, %v1776_v2 }
 0x2c6   :  { %2116 = vst.msk [vmem:[%s4020_s7 + $0xb8] sm:$0xff] %vm2092_vm1, %v1785_v33 }
 0x2c7   :  { %2114 = vst.msk [vmem:[%s4020_s7 + $0xa8] sm:$0xff] %vm2092_vm1, %v1777_v5 }
 0x2c9   :  { %v2698_v9 = vpop.f32.mrb[76].mxu0 }
 0x2ca   :  { %v1798_v10 = vadd.f32 %v2698_v9, %v3511_v35  ;;  %v1789_v11 = vpop.f32.mrb[77].mxu0 }
 0x2cb   :  { %v1790_v14 = vadd.f32 %v3511_v35, %v1789_v11  ;;  %v2699_v15 = vpop.f32.mrb[78].mxu0 }
 0x2cc   :  { %2119 = vst.msk [vmem:[%s4020_s7 + $0xd0] sm:$0xff] %vm2092_vm1, %v1798_v10  ;;  %v1801_v20 = vadd.f32 %v2699_v15, %v3511_v35  ;;  %v1792_v21 = vpop.f32.mrb[79].mxu0 }
 0x2cd   :  { %2117 = vst.msk [vmem:[%s4020_s7 + $0xc0] sm:$0xff] %vm2092_vm1, %v1790_v14  ;;  %v1793_v24 = vadd.f32 %v3511_v35, %v1792_v21 }
 0x2ce   :  { %2120 = vst.msk [vmem:[%s4020_s7 + $0xd8] sm:$0xff] %vm2092_vm1, %v1801_v20 }
 0x2cf   :  { %2118 = vst.msk [vmem:[%s4020_s7 + $0xc8] sm:$0xff] %vm2092_vm1, %v1793_v24 }
 0x2d1   :  { %v2702_v25 = vpop.f32.mrb[80].mxu0 }
 0x2d2   :  { %v1814_v26 = vadd.f32 %v2702_v25, %v3511_v35  ;;  %v1805_v27 = vpop.f32.mrb[81].mxu0 }
 0x2d3   :  { %v1806_v28 = vadd.f32 %v3511_v35, %v1805_v27  ;;  %v2703_v30 = vpop.f32.mrb[82].mxu0 }
 0x2d4   :  { %2123 = vst.msk [vmem:[%s4020_s7 + $0xf0] sm:$0xff] %vm2092_vm1, %v1814_v26  ;;  %v1817_v31 = vadd.f32 %v2703_v30, %v3511_v35  ;;  %v1808_v34 = vpop.f32.mrb[83].mxu0 }
 0x2d5   :  { %2121 = vst.msk [vmem:[%s4020_s7 + $0xe0] sm:$0xff] %vm2092_vm1, %v1806_v28  ;;  %v1809_v36 = vadd.f32 %v3511_v35, %v1808_v34 }
 0x2d6   :  { %2124 = vst.msk [vmem:[%s4020_s7 + $0xf8] sm:$0xff] %vm2092_vm1, %v1817_v31 }
 0x2d7   :  { %2122 = vst.msk [vmem:[%s4020_s7 + $0xe8] sm:$0xff] %vm2092_vm1, %v1809_v36 }
 0x2d9   :  { %v2706_v37 = vpop.f32.mrb[84].mxu0 }
 0x2da   :  { %v1830_v38 = vadd.f32 %v2706_v37, %v3511_v35  ;;  %v1821_v32 = vpop.f32.mrb[85].mxu0 }
 0x2db   :  { %v1822_v39 = vadd.f32 %v3511_v35, %v1821_v32  ;;  %v2707_v40 = vpop.f32.mrb[86].mxu0 }
 0x2dc   :  { %2127 = vst.msk [vmem:[%s4020_s7 + $0x110] sm:$0xff] %vm2092_vm1, %v1830_v38  ;;  %v1833_v41 = vadd.f32 %v2707_v40, %v3511_v35  ;;  %v1824_v42 = vpop.f32.mrb[87].mxu0 }
 0x2dd   :  { %2125 = vst.msk [vmem:[%s4020_s7 + $0x100] sm:$0xff] %vm2092_vm1, %v1822_v39  ;;  %v1825_v43 = vadd.f32 %v3511_v35, %v1824_v42 }
 0x2de   :  { %2128 = vst.msk [vmem:[%s4020_s7 + $0x118] sm:$0xff] %vm2092_vm1, %v1833_v41 }
 0x2df   :  { %2126 = vst.msk [vmem:[%s4020_s7 + $0x108] sm:$0xff] %vm2092_vm1, %v1825_v43 }
 0x2e1   :  { %v2710_v44 = vpop.f32.mrb[88].mxu0 }
 0x2e2   :  { %v1846_v47 = vadd.f32 %v2710_v44, %v3511_v35  ;;  %v1837_v50 = vpop.f32.mrb[89].mxu0 }
 0x2e3   :  { %v1838_v51 = vadd.f32 %v3511_v35, %v1837_v50  ;;  %v2711_v54 = vpop.f32.mrb[90].mxu0 }
 0x2e4   :  { %2131 = vst.msk [vmem:[%s4020_s7 + $0x130] sm:$0xff] %vm2092_vm1, %v1846_v47  ;;  %v1849_v55 = vadd.f32 %v2711_v54, %v3511_v35  ;;  %v1840_v56 = vpop.f32.mrb[91].mxu0 }
 0x2e5   :  { %2129 = vst.msk [vmem:[%s4020_s7 + $0x120] sm:$0xff] %vm2092_vm1, %v1838_v51  ;;  %v1841_v58 = vadd.f32 %v3511_v35, %v1840_v56 }
 0x2e6   :  { %2132 = vst.msk [vmem:[%s4020_s7 + $0x138] sm:$0xff] %vm2092_vm1, %v1849_v55 }
 0x2e7   :  { %2130 = vst.msk [vmem:[%s4020_s7 + $0x128] sm:$0xff] %vm2092_vm1, %v1841_v58 }
 0x2e9   :  { %v2714_v59 = vpop.f32.mrb[92].mxu0 }
 0x2ea   :  { %v1862_v61 = vadd.f32 %v2714_v59, %v3511_v35  ;;  %v1853_v62 = vpop.f32.mrb[93].mxu0 }
 0x2eb   :  { %v1854_v63 = vadd.f32 %v3511_v35, %v1853_v62  ;;  %v2715_v0 = vpop.f32.mrb[94].mxu0 }
 0x2ec   :  { %2135 = vst.msk [vmem:[%s4020_s7 + $0x150] sm:$0xff] %vm2092_vm1, %v1862_v61  ;;  %v1865_v1 = vadd.f32 %v2715_v0, %v3511_v35  ;;  %v1856_v3 = vpop.f32.mrb[95].mxu0 }
 0x2ed   :  { %2133 = vst.msk [vmem:[%s4020_s7 + $0x140] sm:$0xff] %vm2092_vm1, %v1854_v63  ;;  %v1857_v4 = vadd.f32 %v3511_v35, %v1856_v3 }
 0x2ee   :  { %2136 = vst.msk [vmem:[%s4020_s7 + $0x158] sm:$0xff] %vm2092_vm1, %v1865_v1 }
 0x2ef   :  { %2134 = vst.msk [vmem:[%s4020_s7 + $0x148] sm:$0xff] %vm2092_vm1, %v1857_v4 }
 0x2f1   :  { %v2718_v6 = vpop.f32.mrb[96].mxu0 }
 0x2f2   :  { %v1878_v7 = vadd.f32 %v2718_v6, %v3511_v35  ;;  %v1869_v8 = vpop.f32.mrb[97].mxu0 }
 0x2f3   :  { %v1870_v19 = vadd.f32 %v3511_v35, %v1869_v8  ;;  %v2719_v23 = vpop.f32.mrb[98].mxu0 }
 0x2f4   :  { %2139 = vst.msk [vmem:[%s4020_s7 + $0x170] sm:$0xff] %vm2092_vm1, %v1878_v7  ;;  %v1881_v49 = vadd.f32 %v2719_v23, %v3511_v35  ;;  %v1872_v52 = vpop.f32.mrb[99].mxu0 }
 0x2f5   :  { %2137 = vst.msk [vmem:[%s4020_s7 + $0x160] sm:$0xff] %vm2092_vm1, %v1870_v19  ;;  %v1873_v13 = vadd.f32 %v3511_v35, %v1872_v52 }
 0x2f6   :  { %2140 = vst.msk [vmem:[%s4020_s7 + $0x178] sm:$0xff] %vm2092_vm1, %v1881_v49 }
 0x2f7   :  { %2138 = vst.msk [vmem:[%s4020_s7 + $0x168] sm:$0xff] %vm2092_vm1, %v1873_v13 }
 0x2f9   :  { %v2722_v17 = vpop.f32.mrb[100].mxu0 }
 0x2fa   :  { %v1894_v45 = vadd.f32 %v2722_v17, %v3511_v35  ;;  %v1885_v48 = vpop.f32.mrb[101].mxu0 }
 0x2fb   :  { %v1886_v12 = vadd.f32 %v3511_v35, %v1885_v48  ;;  %v2723_v16 = vpop.f32.mrb[102].mxu0 }
 0x2fc   :  { %2143 = vst.msk [vmem:[%s4020_s7 + $0x190] sm:$0xff] %vm2092_vm1, %v1894_v45  ;;  %v1897_v46 = vadd.f32 %v2723_v16, %v3511_v35  ;;  %v1888_v53 = vpop.f32.mrb[103].mxu0 }
 0x2fd   :  { %2141 = vst.msk [vmem:[%s4020_s7 + $0x180] sm:$0xff] %vm2092_vm1, %v1886_v12  ;;  %v1889_v18 = vadd.f32 %v3511_v35, %v1888_v53 }
 0x2fe   :  { %2144 = vst.msk [vmem:[%s4020_s7 + $0x198] sm:$0xff] %vm2092_vm1, %v1897_v46 }
 0x2ff   :  { %2142 = vst.msk [vmem:[%s4020_s7 + $0x188] sm:$0xff] %vm2092_vm1, %v1889_v18 }
 0x301   :  { %v2726_v22 = vpop.f32.mrb[104].mxu0 }
 0x302   :  { %v1910_v57 = vadd.f32 %v2726_v22, %v3511_v35  ;;  %v1901_v60 = vpop.f32.mrb[105].mxu0 }
 0x303   :  { %v1902_v29 = vadd.f32 %v3511_v35, %v1901_v60  ;;  %v2727_v33 = vpop.f32.mrb[106].mxu0 }
 0x304   :  { %2147 = vst.msk [vmem:[%s4020_s7 + $0x1b0] sm:$0xff] %vm2092_vm1, %v1910_v57  ;;  %v1913_v2 = vadd.f32 %v2727_v33, %v3511_v35  ;;  %v1904_v5 = vpop.f32.mrb[107].mxu0 }
 0x305   :  { %2145 = vst.msk [vmem:[%s4020_s7 + $0x1a0] sm:$0xff] %vm2092_vm1, %v1902_v29  ;;  %v1905_v9 = vadd.f32 %v3511_v35, %v1904_v5 }
 0x306   :  { %2148 = vst.msk [vmem:[%s4020_s7 + $0x1b8] sm:$0xff] %vm2092_vm1, %v1913_v2 }
 0x307   :  { %2146 = vst.msk [vmem:[%s4020_s7 + $0x1a8] sm:$0xff] %vm2092_vm1, %v1905_v9 }
 0x309   :  { %v2730_v10 = vpop.f32.mrb[108].mxu0 }
 0x30a   :  { %v1926_v11 = vadd.f32 %v2730_v10, %v3511_v35  ;;  %v1917_v14 = vpop.f32.mrb[109].mxu0 }
 0x30b   :  { %v1918_v15 = vadd.f32 %v3511_v35, %v1917_v14  ;;  %v2731_v20 = vpop.f32.mrb[110].mxu0 }
 0x30c   :  { %2151 = vst.msk [vmem:[%s4020_s7 + $0x1d0] sm:$0xff] %vm2092_vm1, %v1926_v11  ;;  %v1929_v21 = vadd.f32 %v2731_v20, %v3511_v35  ;;  %v1920_v24 = vpop.f32.mrb[111].mxu0 }
 0x30d   :  { %2149 = vst.msk [vmem:[%s4020_s7 + $0x1c0] sm:$0xff] %vm2092_vm1, %v1918_v15  ;;  %v1921_v25 = vadd.f32 %v3511_v35, %v1920_v24 }
 0x30e   :  { %2152 = vst.msk [vmem:[%s4020_s7 + $0x1d8] sm:$0xff] %vm2092_vm1, %v1929_v21 }
 0x30f   :  { %2150 = vst.msk [vmem:[%s4020_s7 + $0x1c8] sm:$0xff] %vm2092_vm1, %v1921_v25 }
 0x311   :  { %v2734_v26 = vpop.f32.mrb[112].mxu0 }
 0x312   :  { %v1942_v27 = vadd.f32 %v2734_v26, %v3511_v35  ;;  %v1933_v28 = vpop.f32.mrb[113].mxu0 }
 0x313   :  { %v1934_v30 = vadd.f32 %v3511_v35, %v1933_v28  ;;  %v2735_v31 = vpop.f32.mrb[114].mxu0 }
 0x314   :  { %2155 = vst.msk [vmem:[%s4020_s7 + $0x1f0] sm:$0xff] %vm2092_vm1, %v1942_v27  ;;  %v1945_v34 = vadd.f32 %v2735_v31, %v3511_v35  ;;  %v1936_v36 = vpop.f32.mrb[115].mxu0 }
 0x315   :  { %2153 = vst.msk [vmem:[%s4020_s7 + $0x1e0] sm:$0xff] %vm2092_vm1, %v1934_v30  ;;  %v1937_v37 = vadd.f32 %v3511_v35, %v1936_v36 }
 0x316   :  { %2156 = vst.msk [vmem:[%s4020_s7 + $0x1f8] sm:$0xff] %vm2092_vm1, %v1945_v34 }
 0x317   :  { %2154 = vst.msk [vmem:[%s4020_s7 + $0x1e8] sm:$0xff] %vm2092_vm1, %v1937_v37 }
 0x319   :  { %v2738_v38 = vpop.f32.mrb[116].mxu0 }
 0x31a   :  { %v1958_v32 = vadd.f32 %v2738_v38, %v3511_v35  ;;  %v1949_v39 = vpop.f32.mrb[117].mxu0 }
 0x31b   :  { %v1950_v40 = vadd.f32 %v3511_v35, %v1949_v39  ;;  %v2739_v41 = vpop.f32.mrb[118].mxu0 }
 0x31c   :  { %2159 = vst.msk [vmem:[%s4020_s7 + $0x210] sm:$0xff] %vm2092_vm1, %v1958_v32  ;;  %v1961_v42 = vadd.f32 %v2739_v41, %v3511_v35  ;;  %v1952_v43 = vpop.f32.mrb[119].mxu0 }
 0x31d   :  { %2157 = vst.msk [vmem:[%s4020_s7 + $0x200] sm:$0xff] %vm2092_vm1, %v1950_v40  ;;  %v1953_v44 = vadd.f32 %v3511_v35, %v1952_v43 }
 0x31e   :  { %2160 = vst.msk [vmem:[%s4020_s7 + $0x218] sm:$0xff] %vm2092_vm1, %v1961_v42 }
 0x31f   :  { %2158 = vst.msk [vmem:[%s4020_s7 + $0x208] sm:$0xff] %vm2092_vm1, %v1953_v44 }
 0x321   :  { %v2742_v47 = vpop.f32.mrb[120].mxu0 }
 0x322   :  { %v1974_v50 = vadd.f32 %v2742_v47, %v3511_v35  ;;  %v1965_v51 = vpop.f32.mrb[121].mxu0 }
 0x323   :  { %v1966_v54 = vadd.f32 %v3511_v35, %v1965_v51  ;;  %v2743_v55 = vpop.f32.mrb[122].mxu0 }
 0x324   :  { %2163 = vst.msk [vmem:[%s4020_s7 + $0x230] sm:$0xff] %vm2092_vm1, %v1974_v50  ;;  %v1977_v56 = vadd.f32 %v2743_v55, %v3511_v35  ;;  %v1968_v58 = vpop.f32.mrb[123].mxu0 }
 0x325   :  { %2161 = vst.msk [vmem:[%s4020_s7 + $0x220] sm:$0xff] %vm2092_vm1, %v1966_v54  ;;  %v1969_v59 = vadd.f32 %v3511_v35, %v1968_v58 }
 0x326   :  { %2164 = vst.msk [vmem:[%s4020_s7 + $0x238] sm:$0xff] %vm2092_vm1, %v1977_v56 }
 0x327   :  { %2162 = vst.msk [vmem:[%s4020_s7 + $0x228] sm:$0xff] %vm2092_vm1, %v1969_v59 }
 0x329   :  { %v2746_v61 = vpop.f32.mrb[124].mxu0 }
 0x32a   :  { %v1990_v62 = vadd.f32 %v2746_v61, %v3511_v35  ;;  %v1981_v63 = vpop.f32.mrb[125].mxu0 }
 0x32b   :  { %v1982_v0 = vadd.f32 %v3511_v35, %v1981_v63  ;;  %v2747_v1 = vpop.f32.mrb[126].mxu0 }
 0x32c   :  { %2167 = vst.msk [vmem:[%s4020_s7 + $0x250] sm:$0xff] %vm2092_vm1, %v1990_v62  ;;  %v1993_v3 = vadd.f32 %v2747_v1, %v3511_v35  ;;  %v1984_v4 = vpop.f32.mrb[127].mxu0 }
 0x32d   :  { %2165 = vst.msk [vmem:[%s4020_s7 + $0x240] sm:$0xff] %vm2092_vm1, %v1982_v0  ;;  %v1985_v6 = vadd.f32 %v3511_v35, %v1984_v4 }
 0x32e   :  { %2168 = vst.msk [vmem:[%s4020_s7 + $0x258] sm:$0xff] %vm2092_vm1, %v1993_v3 }
 0x32f   :  { %2166 = vst.msk [vmem:[%s4020_s7 + $0x248] sm:$0xff] %vm2092_vm1, %v1985_v6 }
 0x331   :  { %v2750_v7 = vpop.f32.mrb[128].mxu0 }
 0x332   :  { %v2006_v8 = vadd.f32 %v2750_v7, %v3511_v35  ;;  %v1997_v19 = vpop.f32.mrb[129].mxu0 }
 0x333   :  { %v1998_v23 = vadd.f32 %v3511_v35, %v1997_v19  ;;  %v2751_v49 = vpop.f32.mrb[130].mxu0 }
 0x334   :  { %2171 = vst.msk [vmem:[%s4020_s7 + $0x270] sm:$0xff] %vm2092_vm1, %v2006_v8  ;;  %v2009_v52 = vadd.f32 %v2751_v49, %v3511_v35  ;;  %v2000_v13 = vpop.f32.mrb[131].mxu0 }
 0x335   :  { %2169 = vst.msk [vmem:[%s4020_s7 + $0x260] sm:$0xff] %vm2092_vm1, %v1998_v23  ;;  %v2001_v17 = vadd.f32 %v3511_v35, %v2000_v13 }
 0x336   :  { %2172 = vst.msk [vmem:[%s4020_s7 + $0x278] sm:$0xff] %vm2092_vm1, %v2009_v52 }
 0x337   :  { %2170 = vst.msk [vmem:[%s4020_s7 + $0x268] sm:$0xff] %vm2092_vm1, %v2001_v17 }
 0x339   :  { %v2754_v45 = vpop.f32.mrb[132].mxu0 }
 0x33a   :  { %v2022_v48 = vadd.f32 %v2754_v45, %v3511_v35  ;;  %v2013_v12 = vpop.f32.mrb[133].mxu0 }
 0x33b   :  { %v2014_v16 = vadd.f32 %v3511_v35, %v2013_v12  ;;  %v2755_v46 = vpop.f32.mrb[134].mxu0 }
 0x33c   :  { %2175 = vst.msk [vmem:[%s4020_s7 + $0x290] sm:$0xff] %vm2092_vm1, %v2022_v48  ;;  %v2025_v53 = vadd.f32 %v2755_v46, %v3511_v35  ;;  %v2016_v18 = vpop.f32.mrb[135].mxu0 }
 0x33d   :  { %2173 = vst.msk [vmem:[%s4020_s7 + $0x280] sm:$0xff] %vm2092_vm1, %v2014_v16  ;;  %v2017_v22 = vadd.f32 %v3511_v35, %v2016_v18 }
 0x33e   :  { %2176 = vst.msk [vmem:[%s4020_s7 + $0x298] sm:$0xff] %vm2092_vm1, %v2025_v53 }
 0x33f   :  { %2174 = vst.msk [vmem:[%s4020_s7 + $0x288] sm:$0xff] %vm2092_vm1, %v2017_v22 }
 0x341   :  { %v2758_v57 = vpop.f32.mrb[136].mxu0 }
 0x342   :  { %v2038_v60 = vadd.f32 %v2758_v57, %v3511_v35  ;;  %v2029_v29 = vpop.f32.mrb[137].mxu0 }
 0x343   :  { %v2030_v33 = vadd.f32 %v3511_v35, %v2029_v29  ;;  %v2759_v2 = vpop.f32.mrb[138].mxu0 }
 0x344   :  { %2179 = vst.msk [vmem:[%s4020_s7 + $0x2b0] sm:$0xff] %vm2092_vm1, %v2038_v60  ;;  %v2041_v5 = vadd.f32 %v2759_v2, %v3511_v35  ;;  %v2032_v9 = vpop.f32.mrb[139].mxu0 }
 0x345   :  { %2177 = vst.msk [vmem:[%s4020_s7 + $0x2a0] sm:$0xff] %vm2092_vm1, %v2030_v33  ;;  %v2033_v10 = vadd.f32 %v3511_v35, %v2032_v9 }
 0x346   :  { %2180 = vst.msk [vmem:[%s4020_s7 + $0x2b8] sm:$0xff] %vm2092_vm1, %v2041_v5 }
 0x347   :  { %2178 = vst.msk [vmem:[%s4020_s7 + $0x2a8] sm:$0xff] %vm2092_vm1, %v2033_v10 }
 0x349   :  { %v2762_v11 = vpop.f32.mrb[140].mxu0 }
 0x34a   :  { %v2054_v14 = vadd.f32 %v2762_v11, %v3511_v35  ;;  %v2045_v15 = vpop.f32.mrb[141].mxu0 }
 0x34b   :  { %v2046_v20 = vadd.f32 %v3511_v35, %v2045_v15  ;;  %v2763_v21 = vpop.f32.mrb[142].mxu0 }
 0x34c   :  { %2183 = vst.msk [vmem:[%s4020_s7 + $0x2d0] sm:$0xff] %vm2092_vm1, %v2054_v14  ;;  %v2057_v24 = vadd.f32 %v2763_v21, %v3511_v35  ;;  %v2048_v25 = vpop.f32.mrb[143].mxu0 }
 0x34d   :  { %2181 = vst.msk [vmem:[%s4020_s7 + $0x2c0] sm:$0xff] %vm2092_vm1, %v2046_v20  ;;  %v2049_v26 = vadd.f32 %v3511_v35, %v2048_v25 }
 0x34e   :  { %2184 = vst.msk [vmem:[%s4020_s7 + $0x2d8] sm:$0xff] %vm2092_vm1, %v2057_v24 }
 0x34f   :  { %2182 = vst.msk [vmem:[%s4020_s7 + $0x2c8] sm:$0xff] %vm2092_vm1, %v2049_v26 }
 0x351   :  { %v2766_v27 = vpop.f32.mrb[144].mxu0 }
 0x352   :  { %v2070_v28 = vadd.f32 %v2766_v27, %v3511_v35  ;;  %v2061_v30 = vpop.f32.mrb[145].mxu0 }
 0x353   :  { %v2062_v31 = vadd.f32 %v3511_v35, %v2061_v30  ;;  %v2767_v34 = vpop.f32.mrb[146].mxu0 }
 0x354   :  { %2187 = vst.msk [vmem:[%s4020_s7 + $0x2f0] sm:$0xff] %vm2092_vm1, %v2070_v28  ;;  %v2073_v36 = vadd.f32 %v2767_v34, %v3511_v35  ;;  %v2064_v37 = vpop.f32.mrb[147].mxu0 }
 0x355   :  { %2185 = vst.msk [vmem:[%s4020_s7 + $0x2e0] sm:$0xff] %vm2092_vm1, %v2062_v31  ;;  %v2065_v38 = vadd.f32 %v3511_v35, %v2064_v37 }
 0x356   :  { %2188 = vst.msk [vmem:[%s4020_s7 + $0x2f8] sm:$0xff] %vm2092_vm1, %v2073_v36 }
 0x357   :  { %2186 = vst.msk [vmem:[%s4020_s7 + $0x2e8] sm:$0xff] %vm2092_vm1, %v2065_v38 }
 0x359   :  { %v2770_v32 = vpop.f32.mrb[148].mxu0 }
 0x35a   :  { %v2086_v39 = vadd.f32 %v2770_v32, %v3511_v35  ;;  %v2077_v40 = vpop.f32.mrb[149].mxu0 }
 0x35b   :  { %v2078_v41 = vadd.f32 %v3511_v35, %v2077_v40  ;;  %v2771_v42 = vpop.f32.mrb[150].mxu0 }
 0x35c   :  { %2191 = vst.msk [vmem:[%s4020_s7 + $0x310] sm:$0xff] %vm2092_vm1, %v2086_v39  ;;  %v2089_v43 = vadd.f32 %v2771_v42, %v3511_v35  ;;  %v2080_v44 = vpop.f32.mrb[151].mxu0 }
 0x35d   :  { %2189 = vst.msk [vmem:[%s4020_s7 + $0x300] sm:$0xff] %vm2092_vm1, %v2078_v41  ;;  %v2081_v47 = vadd.f32 %v3511_v35, %v2080_v44 }
 0x35e   :  { %2192 = vst.msk [vmem:[%s4020_s7 + $0x318] sm:$0xff] %vm2092_vm1, %v2089_v43 }
 0x35f   :  { %2190 = vst.msk [vmem:[%s4020_s7 + $0x308] sm:$0xff] %vm2092_vm1, %v2081_v47 }

</bundles_post_ra>
